<compile_context>
chip_gen: v7x
topology: tpu7x:2x2x1
jax: 0.10.0
libtpu: 0.0.40
codegen_flags: <defaults>
</compile_context>

<pallas_src>
import functools
import math

import jax
import jax.numpy as jnp
from jax.experimental import pallas as pl
from jax.experimental.pallas import tpu as pltpu


# ----------------------------------------------------------------------------
# Pallas kernel: full VAE forward for one batch tile
# ----------------------------------------------------------------------------
def vae_kernel(
    x_ref,                        # (TB, D_in)   f32  (cast to bf16 in-kernel)
    w1_ref, b1_ref,               # (D_in, 512) bf16, (1, 512) f32
    w2_ref, b2_ref,               # (512, 256)  bf16, (1, 256) f32
    wml_ref, bml_ref,             # (256, HEAD) bf16, (1, HEAD) f32  [mean||logvar||0 fused]
    wd1_ref, bd1_ref,             # (L, 256)    bf16, (1, 256) f32
    wd2_ref, bd2_ref,             # (256, 512)  bf16, (1, 512) f32
    wd3_ref, bd3_ref,             # (512, D_in) bf16, (1, D_in) f32
    eps_ref,                      # (TB, L)     f32  pre-sampled N(0,1) noise
    recon_ref,                    # out: (TB, D_in) f32
    ml_ref,                       # out: (TB, HEAD) f32  (mean || logvar || zero-pad)
    *,
    latent,
):
    # in-kernel cast (removes a separate XLA cast launch + HBM round trip)
    x = x_ref[...].astype(jnp.bfloat16)

    # ---- encoder (bf16 operands, f32 accumulation, f32 elementwise) ----
    h = jnp.dot(x, w1_ref[...], preferred_element_type=jnp.float32) + b1_ref[...]
    h = jnp.maximum(h, 0.0)
    h = jnp.dot(h.astype(jnp.bfloat16), w2_ref[...],
                preferred_element_type=jnp.float32) + b2_ref[...]
    h = jnp.maximum(h, 0.0)

    # fused, lane-dense mean/logvar head: single (256, HEAD) dot
    ml = jnp.dot(h.astype(jnp.bfloat16), wml_ref[...],
                 preferred_element_type=jnp.float32) + bml_ref[...]
    mean = ml[:, :latent]
    logvar = ml[:, latent:2 * latent]

    # ---- reparameterize: z = mean + eps * exp(0.5 * logvar) (all f32) ----
    std = jnp.exp(0.5 * logvar)
    z = mean + eps_ref[...] * std

    # ---- decoder ----
    d = jnp.dot(z.astype(jnp.bfloat16), wd1_ref[...],
                preferred_element_type=jnp.float32) + bd1_ref[...]
    d = jnp.maximum(d, 0.0)
    d = jnp.dot(d.astype(jnp.bfloat16), wd2_ref[...],
                preferred_element_type=jnp.float32) + bd2_ref[...]
    d = jnp.maximum(d, 0.0)
    logits = jnp.dot(d.astype(jnp.bfloat16), wd3_ref[...],
                     preferred_element_type=jnp.float32) + bd3_ref[...]

    recon_ref[...] = jax.nn.sigmoid(logits)     # f32 out (keeps module semantics)
    ml_ref[...] = ml                            # unmasked 128-lane store


# ----------------------------------------------------------------------------
# One-time weight preparation (hoisted out of the per-call path)
# ----------------------------------------------------------------------------
def prepare_params(params):
    """bf16-cast all matmul weights, fuse + lane-pad the mean/logvar head.

    Call once and reuse the result across forward calls."""
    L = params["wm"].shape[1]
    head = max(128, ((2 * L + 127) // 128) * 128)   # lane-dense padded width

    wml = jnp.concatenate([params["wm"], params["wlv"]], axis=1)
    bml = jnp.concatenate([params["bm"], params["blv"]], axis=1)
    wml = jnp.pad(wml, ((0, 0), (0, head - 2 * L)))
    bml = jnp.pad(bml, ((0, 0), (0, head - 2 * L)))

    prep = {
        "w1": params["w1"].astype(jnp.bfloat16), "b1": params["b1"],
        "w2": params["w2"].astype(jnp.bfloat16), "b2": params["b2"],
        "wml": wml.astype(jnp.bfloat16),         "bml": bml,
        "wd1": params["wd1"].astype(jnp.bfloat16), "bd1": params["bd1"],
        "wd2": params["wd2"].astype(jnp.bfloat16), "bd2": params["bd2"],
        "wd3": params["wd3"].astype(jnp.bfloat16), "bd3": params["bd3"],
    }
    return jax.block_until_ready(prep)


# ----------------------------------------------------------------------------
# Wrapper
# ----------------------------------------------------------------------------
def vae_forward(x_img, prep, eps, *, tile_b=128):
    """x_img: (B, C, H, W) float32.  prep: output of prepare_params.
    eps: (B, L) float32.  Returns (recon (B, D_in), mean (B, L), logvar (B, L))."""
    B = x_img.shape[0]
    D_in = x_img.shape[1] * x_img.shape[2] * x_img.shape[3]
    L = prep["wd1"].shape[0]
    head = prep["wml"].shape[1]

    # glue: flatten NCHW -> (B, C*H*W), matching x.view(-1, C*H*W) in PyTorch
    x = x_img.reshape(B, D_in).astype(jnp.float32)
    eps = eps.astype(jnp.float32)

    # pad batch to a multiple of the tile (tile rows must be a multiple of 8).
    # Default tile_b=128 -> grid=(1,) for typical batches (single-TC v5e/v6e);
    # pass tile_b=64 to benchmark the v7x 2-TC "parallel" split.
    TB = min(tile_b, max(8, ((B + 7) // 8) * 8))
    Bp = ((B + TB - 1) // TB) * TB
    if Bp != B:
        x = jnp.pad(x, ((0, Bp - B), (0, 0)))
        eps = jnp.pad(eps, ((0, Bp - B), (0, 0)))
    grid = (Bp // TB,)

    # batch-tiled specs for activations / outputs; weights VMEM-resident
    def row_spec(last_dim):
        return pl.BlockSpec((TB, last_dim), lambda i: (i, 0))

    def resident_spec(arr):
        return pl.BlockSpec(arr.shape, lambda i: (0, 0))

    weight_args = [
        prep["w1"], prep["b1"],
        prep["w2"], prep["b2"],
        prep["wml"], prep["bml"],
        prep["wd1"], prep["bd1"],
        prep["wd2"], prep["bd2"],
        prep["wd3"], prep["bd3"],
    ]

    in_specs = (
        [row_spec(D_in)]
        + [resident_spec(a) for a in weight_args]
        + [row_spec(L)]
    )

    recon, ml = pl.pallas_call(
        functools.partial(vae_kernel, latent=L),
        out_shape=(
            jax.ShapeDtypeStruct((Bp, D_in), jnp.float32),
            jax.ShapeDtypeStruct((Bp, head), jnp.float32),
        ),
        grid=grid,
        in_specs=in_specs,
        out_specs=(row_spec(D_in), row_spec(head)),
        compiler_params=pltpu.CompilerParams(
            dimension_semantics=("parallel",),
            vmem_limit_bytes=16 * 1024 * 1024,
        ),
    )(x, *weight_args, eps)

    recon = recon[:B]
    mean = ml[:B, :L]
    logvar = ml[:B, L:2 * L]
    return recon, mean, logvar


# ----------------------------------------------------------------------------
# Deterministic parameter init (PyTorch-style uniform(-k, k), k=1/sqrt(fan_in))
# ----------------------------------------------------------------------------
def init_linear(key, fan_in, fan_out):
    kw, kb = jax.random.split(key)
    k = 1.0 / math.sqrt(fan_in)
    # stored as (in, out): kernel computes x @ W + b
    wgt = jax.random.uniform(kw, (fan_in, fan_out), jnp.float32, -k, k)
    b = jax.random.uniform(kb, (1, fan_out), jnp.float32, -k, k)
    return wgt, b


def init_params(key, input_dim, latent_space):
    keys = jax.random.split(key, 7)
    p = {}
    p["w1"], p["b1"] = init_linear(keys[0], input_dim, 512)
    p["w2"], p["b2"] = init_linear(keys[1], 512, 256)
    p["wm"], p["bm"] = init_linear(keys[2], 256, latent_space)
    p["wlv"], p["blv"] = init_linear(keys[3], 256, latent_space)
    p["wd1"], p["bd1"] = init_linear(keys[4], latent_space, 256)
    p["wd2"], p["bd2"] = init_linear(keys[5], 256, 512)
    p["wd3"], p["bd3"] = init_linear(keys[6], 512, input_dim)
    return p


# ----------------------------------------------------------------------------
# Plain-JAX reference with the SAME precision policy (bf16 dots, f32 acc)
# ----------------------------------------------------------------------------
def vae_reference(x_img, params, eps):
    B = x_img.shape[0]
    D_in = x_img.shape[1] * x_img.shape[2] * x_img.shape[3]
    L = params["wm"].shape[1]

    def dot(a, w):
        return jnp.dot(a.astype(jnp.bfloat16), w.astype(jnp.bfloat16),
                       preferred_element_type=jnp.float32)

    xf = x_img.reshape(B, D_in)
    h = jax.nn.relu(dot(xf, params["w1"]) + params["b1"])
    h = jax.nn.relu(dot(h, params["w2"]) + params["b2"])
    wml = jnp.concatenate([params["wm"], params["wlv"]], axis=1)
    bml = jnp.concatenate([params["bm"], params["blv"]], axis=1)
    ml = dot(h, wml) + bml
    mean, logvar = ml[:, :L], ml[:, L:]
    z = mean + eps * jnp.exp(0.5 * logvar)
    d = jax.nn.relu(dot(z, params["wd1"]) + params["bd1"])
    d = jax.nn.relu(dot(d, params["wd2"]) + params["bd2"])
    recon = jax.nn.sigmoid(dot(d, params["wd3"]) + params["bd3"])
    return recon, mean, logvar


if __name__ == "__main__":
    # small shapes consistent with the module: single-channel 16x16 images
    # (D_in = 256, lane-dense), latent 32
    B, C, H, W = 8, 1, 16, 16
    input_dim = C * H * W          # 256
    latent_space = 32

    root = jax.random.PRNGKey(0)
    k_params, k_x, k_eps = jax.random.split(root, 3)

    params = init_params(k_params, input_dim, latent_space)
    prep = prepare_params(params)   # one-time bf16 cast + fused/padded head

    x_img = jax.random.uniform(k_x, (B, C, H, W), jnp.float32)       # NCHW input
    eps = jax.random.normal(k_eps, (B, latent_space), jnp.float32)   # reparam noise

    recon, mean, logvar = vae_forward(x_img, prep, eps)
    jax.block_until_ready((recon, mean, logvar))

    # sanity check against a plain-JAX reference using the same precision policy
    recon_r, mean_r, logvar_r = vae_reference(x_img, params, eps)

    assert recon.shape == (B, input_dim)
    assert mean.shape == (B, latent_space)
    assert logvar.shape == (B, latent_space)
    assert jnp.allclose(recon, recon_r, atol=2e-3, rtol=2e-3)
    assert jnp.allclose(mean, mean_r, atol=2e-3, rtol=2e-3)
    assert jnp.allclose(logvar, logvar_r, atol=2e-3, rtol=2e-3)

    print("KERNEL_OK")
</pallas_src>

<mosaic_0001>
module attributes {stable_mosaic.version = 11 : i64} {
  func.func @vae_kernel(%arg0: i32, %arg1: memref<8x256xf32, #tpu.memory_space<vmem>>, %arg2: memref<256x512xbf16, #tpu.memory_space<vmem>>, %arg3: memref<1x512xf32, #tpu.memory_space<vmem>>, %arg4: memref<512x256xbf16, #tpu.memory_space<vmem>>, %arg5: memref<1x256xf32, #tpu.memory_space<vmem>>, %arg6: memref<256x128xbf16, #tpu.memory_space<vmem>>, %arg7: memref<1x128xf32, #tpu.memory_space<vmem>>, %arg8: memref<32x256xbf16, #tpu.memory_space<vmem>>, %arg9: memref<1x256xf32, #tpu.memory_space<vmem>>, %arg10: memref<256x512xbf16, #tpu.memory_space<vmem>>, %arg11: memref<1x512xf32, #tpu.memory_space<vmem>>, %arg12: memref<512x256xbf16, #tpu.memory_space<vmem>>, %arg13: memref<1x256xf32, #tpu.memory_space<vmem>>, %arg14: memref<8x32xf32, #tpu.memory_space<vmem>>, %arg15: memref<8x256xf32, #tpu.memory_space<vmem>>, %arg16: memref<8x128xf32, #tpu.memory_space<vmem>>) attributes {dimension_semantics = [#tpu.dimension_semantics<parallel>], iteration_bounds = array<i64: 1>, scalar_prefetch = 0 : i64, scratch_operands = 0 : i64, tpu.core_type = #tpu.core_type<tc>, window_params = [{transform_indices = @transform_0, window_bounds = array<i64: 8, 256>}, {pipeline_mode = #tpu.pipeline_mode<synchronous>, transform_indices = @transform_1, window_bounds = array<i64: 256, 512>}, {pipeline_mode = #tpu.pipeline_mode<synchronous>, transform_indices = @transform_2, window_bounds = array<i64: 1, 512>}, {pipeline_mode = #tpu.pipeline_mode<synchronous>, transform_indices = @transform_3, window_bounds = array<i64: 512, 256>}, {pipeline_mode = #tpu.pipeline_mode<synchronous>, transform_indices = @transform_4, window_bounds = array<i64: 1, 256>}, {pipeline_mode = #tpu.pipeline_mode<synchronous>, transform_indices = @transform_5, window_bounds = array<i64: 256, 128>}, {pipeline_mode = #tpu.pipeline_mode<synchronous>, transform_indices = @transform_6, window_bounds = array<i64: 1, 128>}, {pipeline_mode = #tpu.pipeline_mode<synchronous>, transform_indices = @transform_7, window_bounds = array<i64: 32, 256>}, {pipeline_mode = #tpu.pipeline_mode<synchronous>, transform_indices = @transform_8, window_bounds = array<i64: 1, 256>}, {pipeline_mode = #tpu.pipeline_mode<synchronous>, transform_indices = @transform_9, window_bounds = array<i64: 256, 512>}, {pipeline_mode = #tpu.pipeline_mode<synchronous>, transform_indices = @transform_10, window_bounds = array<i64: 1, 512>}, {pipeline_mode = #tpu.pipeline_mode<synchronous>, transform_indices = @transform_11, window_bounds = array<i64: 512, 256>}, {pipeline_mode = #tpu.pipeline_mode<synchronous>, transform_indices = @transform_12, window_bounds = array<i64: 1, 256>}, {transform_indices = @transform_13, window_bounds = array<i64: 8, 32>}, {transform_indices = @transform_14, window_bounds = array<i64: 8, 256>}, {transform_indices = @transform_15, window_bounds = array<i64: 8, 128>}]} {
    %c0 = arith.constant 0 : index
    %c0_0 = arith.constant 0 : index
    %0 = vector.load %arg1[%c0, %c0_0] : memref<8x256xf32, #tpu.memory_space<vmem>>, vector<8x256xf32>
    %1 = arith.truncf %0 : vector<8x256xf32> to vector<8x256xbf16>
    %c0_1 = arith.constant 0 : index
    %c0_2 = arith.constant 0 : index
    %2 = vector.load %arg2[%c0_1, %c0_2] : memref<256x512xbf16, #tpu.memory_space<vmem>>, vector<256x512xbf16>
    %cst = arith.constant dense<0.000000e+00> : vector<8x512xf32>
    %3 = tpu.matmul %1, %2, %cst {dimension_numbers = #tpu.dot_dimension_numbers<[1], [0], [0], [1], [0, 0, 1, 1], [], []>} : vector<8x256xbf16>, vector<256x512xbf16>, vector<8x512xf32> -> vector<8x512xf32>
    %c0_3 = arith.constant 0 : index
    %c0_4 = arith.constant 0 : index
    %4 = vector.load %arg3[%c0_3, %c0_4] : memref<1x512xf32, #tpu.memory_space<vmem>>, vector<1x512xf32>
    %5 = vector.broadcast %4 : vector<1x512xf32> to vector<8x512xf32>
    %6 = arith.addf %3, %5 : vector<8x512xf32>
    %cst_5 = arith.constant 0.000000e+00 : f32
    %7 = vector.broadcast %cst_5 : f32 to vector<8x512xf32>
    %8 = arith.maximumf %6, %7 : vector<8x512xf32>
    %9 = arith.truncf %8 : vector<8x512xf32> to vector<8x512xbf16>
    %c0_6 = arith.constant 0 : index
    %c0_7 = arith.constant 0 : index
    %10 = vector.load %arg4[%c0_6, %c0_7] : memref<512x256xbf16, #tpu.memory_space<vmem>>, vector<512x256xbf16>
    %cst_8 = arith.constant dense<0.000000e+00> : vector<8x256xf32>
    %11 = tpu.matmul %9, %10, %cst_8 {dimension_numbers = #tpu.dot_dimension_numbers<[1], [0], [0], [1], [0, 0, 1, 1], [], []>} : vector<8x512xbf16>, vector<512x256xbf16>, vector<8x256xf32> -> vector<8x256xf32>
    %c0_9 = arith.constant 0 : index
    %c0_10 = arith.constant 0 : index
    %12 = vector.load %arg5[%c0_9, %c0_10] : memref<1x256xf32, #tpu.memory_space<vmem>>, vector<1x256xf32>
    %13 = vector.broadcast %12 : vector<1x256xf32> to vector<8x256xf32>
    %14 = arith.addf %11, %13 : vector<8x256xf32>
    %cst_11 = arith.constant 0.000000e+00 : f32
    %15 = vector.broadcast %cst_11 : f32 to vector<8x256xf32>
    %16 = arith.maximumf %14, %15 : vector<8x256xf32>
    %17 = arith.truncf %16 : vector<8x256xf32> to vector<8x256xbf16>
    %c0_12 = arith.constant 0 : index
    %c0_13 = arith.constant 0 : index
    %18 = vector.load %arg6[%c0_12, %c0_13] : memref<256x128xbf16, #tpu.memory_space<vmem>>, vector<256x128xbf16>
    %cst_14 = arith.constant dense<0.000000e+00> : vector<8x128xf32>
    %19 = tpu.matmul %17, %18, %cst_14 {dimension_numbers = #tpu.dot_dimension_numbers<[1], [0], [0], [1], [0, 0, 1, 1], [], []>} : vector<8x256xbf16>, vector<256x128xbf16>, vector<8x128xf32> -> vector<8x128xf32>
    %c0_15 = arith.constant 0 : index
    %c0_16 = arith.constant 0 : index
    %20 = vector.load %arg7[%c0_15, %c0_16] : memref<1x128xf32, #tpu.memory_space<vmem>>, vector<1x128xf32>
    %21 = vector.broadcast %20 : vector<1x128xf32> to vector<8x128xf32>
    %22 = arith.addf %19, %21 : vector<8x128xf32>
    %23 = vector.extract_strided_slice %22 {offsets = [0, 0], sizes = [8, 32], strides = [1, 1]} : vector<8x128xf32> to vector<8x32xf32>
    %24 = vector.extract_strided_slice %22 {offsets = [0, 32], sizes = [8, 32], strides = [1, 1]} : vector<8x128xf32> to vector<8x32xf32>
    %cst_17 = arith.constant 5.000000e-01 : f32
    %25 = vector.broadcast %cst_17 : f32 to vector<8x32xf32>
    %26 = arith.mulf %25, %24 : vector<8x32xf32>
    %27 = math.exp %26 : vector<8x32xf32>
    %c0_18 = arith.constant 0 : index
    %c0_19 = arith.constant 0 : index
    %28 = vector.load %arg14[%c0_18, %c0_19] : memref<8x32xf32, #tpu.memory_space<vmem>>, vector<8x32xf32>
    %29 = arith.mulf %28, %27 : vector<8x32xf32>
    %30 = arith.addf %23, %29 : vector<8x32xf32>
    %31 = arith.truncf %30 : vector<8x32xf32> to vector<8x32xbf16>
    %c0_20 = arith.constant 0 : index
    %c0_21 = arith.constant 0 : index
    %32 = vector.load %arg8[%c0_20, %c0_21] : memref<32x256xbf16, #tpu.memory_space<vmem>>, vector<32x256xbf16>
    %cst_22 = arith.constant dense<0.000000e+00> : vector<8x256xf32>
    %33 = tpu.matmul %31, %32, %cst_22 {dimension_numbers = #tpu.dot_dimension_numbers<[1], [0], [0], [1], [0, 0, 1, 1], [], []>} : vector<8x32xbf16>, vector<32x256xbf16>, vector<8x256xf32> -> vector<8x256xf32>
    %c0_23 = arith.constant 0 : index
    %c0_24 = arith.constant 0 : index
    %34 = vector.load %arg9[%c0_23, %c0_24] : memref<1x256xf32, #tpu.memory_space<vmem>>, vector<1x256xf32>
    %35 = vector.broadcast %34 : vector<1x256xf32> to vector<8x256xf32>
    %36 = arith.addf %33, %35 : vector<8x256xf32>
    %cst_25 = arith.constant 0.000000e+00 : f32
    %37 = vector.broadcast %cst_25 : f32 to vector<8x256xf32>
    %38 = arith.maximumf %36, %37 : vector<8x256xf32>
    %39 = arith.truncf %38 : vector<8x256xf32> to vector<8x256xbf16>
    %c0_26 = arith.constant 0 : index
    %c0_27 = arith.constant 0 : index
    %40 = vector.load %arg10[%c0_26, %c0_27] : memref<256x512xbf16, #tpu.memory_space<vmem>>, vector<256x512xbf16>
    %cst_28 = arith.constant dense<0.000000e+00> : vector<8x512xf32>
    %41 = tpu.matmul %39, %40, %cst_28 {dimension_numbers = #tpu.dot_dimension_numbers<[1], [0], [0], [1], [0, 0, 1, 1], [], []>} : vector<8x256xbf16>, vector<256x512xbf16>, vector<8x512xf32> -> vector<8x512xf32>
    %c0_29 = arith.constant 0 : index
    %c0_30 = arith.constant 0 : index
    %42 = vector.load %arg11[%c0_29, %c0_30] : memref<1x512xf32, #tpu.memory_space<vmem>>, vector<1x512xf32>
    %43 = vector.broadcast %42 : vector<1x512xf32> to vector<8x512xf32>
    %44 = arith.addf %41, %43 : vector<8x512xf32>
    %cst_31 = arith.constant 0.000000e+00 : f32
    %45 = vector.broadcast %cst_31 : f32 to vector<8x512xf32>
    %46 = arith.maximumf %44, %45 : vector<8x512xf32>
    %47 = arith.truncf %46 : vector<8x512xf32> to vector<8x512xbf16>
    %c0_32 = arith.constant 0 : index
    %c0_33 = arith.constant 0 : index
    %48 = vector.load %arg12[%c0_32, %c0_33] : memref<512x256xbf16, #tpu.memory_space<vmem>>, vector<512x256xbf16>
    %cst_34 = arith.constant dense<0.000000e+00> : vector<8x256xf32>
    %49 = tpu.matmul %47, %48, %cst_34 {dimension_numbers = #tpu.dot_dimension_numbers<[1], [0], [0], [1], [0, 0, 1, 1], [], []>} : vector<8x512xbf16>, vector<512x256xbf16>, vector<8x256xf32> -> vector<8x256xf32>
    %c0_35 = arith.constant 0 : index
    %c0_36 = arith.constant 0 : index
    %50 = vector.load %arg13[%c0_35, %c0_36] : memref<1x256xf32, #tpu.memory_space<vmem>>, vector<1x256xf32>
    %51 = vector.broadcast %50 : vector<1x256xf32> to vector<8x256xf32>
    %52 = arith.addf %49, %51 : vector<8x256xf32>
    %53 = arith.negf %52 : vector<8x256xf32>
    %54 = math.exp %53 : vector<8x256xf32>
    %cst_37 = arith.constant 1.000000e+00 : f32
    %55 = vector.broadcast %cst_37 : f32 to vector<8x256xf32>
    %56 = arith.addf %55, %54 : vector<8x256xf32>
    %57 = arith.divf %55, %56 : vector<8x256xf32>
    %c0_38 = arith.constant 0 : index
    %c0_39 = arith.constant 0 : index
    %58 = vector.load %arg15[%c0_38, %c0_39] : memref<8x256xf32, #tpu.memory_space<vmem>>, vector<8x256xf32>
    tpu.vector_store %arg15[%c0_38, %c0_39], %57 {strides = array<i32>} : memref<8x256xf32, #tpu.memory_space<vmem>>, vector<8x256xf32>,
    %c0_40 = arith.constant 0 : index
    %c0_41 = arith.constant 0 : index
    %59 = vector.load %arg16[%c0_40, %c0_41] : memref<8x128xf32, #tpu.memory_space<vmem>>, vector<8x128xf32>
    tpu.vector_store %arg16[%c0_40, %c0_41], %22 {strides = array<i32>} : memref<8x128xf32, #tpu.memory_space<vmem>>, vector<8x128xf32>,
    return
  }
  func.func @transform_0(%arg0: i32) -> (i32, i32) {
    %c0_i32 = arith.constant 0 : i32
    %c0_i32_0 = arith.constant 0 : i32
    return %arg0, %c0_i32 : i32, i32
  }
  func.func @transform_1(%arg0: i32) -> (i32, i32) {
    %c0_i32 = arith.constant 0 : i32
    %c0_i32_0 = arith.constant 0 : i32
    %c0_i32_1 = arith.constant 0 : i32
    return %c0_i32, %c0_i32_0 : i32, i32
  }
  func.func @transform_2(%arg0: i32) -> (i32, i32) {
    %c0_i32 = arith.constant 0 : i32
    %c0_i32_0 = arith.constant 0 : i32
    %c0_i32_1 = arith.constant 0 : i32
    return %c0_i32, %c0_i32_0 : i32, i32
  }
  func.func @transform_3(%arg0: i32) -> (i32, i32) {
    %c0_i32 = arith.constant 0 : i32
    %c0_i32_0 = arith.constant 0 : i32
    %c0_i32_1 = arith.constant 0 : i32
    return %c0_i32, %c0_i32_0 : i32, i32
  }
  func.func @transform_4(%arg0: i32) -> (i32, i32) {
    %c0_i32 = arith.constant 0 : i32
    %c0_i32_0 = arith.constant 0 : i32
    %c0_i32_1 = arith.constant 0 : i32
    return %c0_i32, %c0_i32_0 : i32, i32
  }
  func.func @transform_5(%arg0: i32) -> (i32, i32) {
    %c0_i32 = arith.constant 0 : i32
    %c0_i32_0 = arith.constant 0 : i32
    %c0_i32_1 = arith.constant 0 : i32
    return %c0_i32, %c0_i32_0 : i32, i32
  }
  func.func @transform_6(%arg0: i32) -> (i32, i32) {
    %c0_i32 = arith.constant 0 : i32
    %c0_i32_0 = arith.constant 0 : i32
    %c0_i32_1 = arith.constant 0 : i32
    return %c0_i32, %c0_i32_0 : i32, i32
  }
  func.func @transform_7(%arg0: i32) -> (i32, i32) {
    %c0_i32 = arith.constant 0 : i32
    %c0_i32_0 = arith.constant 0 : i32
    %c0_i32_1 = arith.constant 0 : i32
    return %c0_i32, %c0_i32_0 : i32, i32
  }
  func.func @transform_8(%arg0: i32) -> (i32, i32) {
    %c0_i32 = arith.constant 0 : i32
    %c0_i32_0 = arith.constant 0 : i32
    %c0_i32_1 = arith.constant 0 : i32
    return %c0_i32, %c0_i32_0 : i32, i32
  }
  func.func @transform_9(%arg0: i32) -> (i32, i32) {
    %c0_i32 = arith.constant 0 : i32
    %c0_i32_0 = arith.constant 0 : i32
    %c0_i32_1 = arith.constant 0 : i32
    return %c0_i32, %c0_i32_0 : i32, i32
  }
  func.func @transform_10(%arg0: i32) -> (i32, i32) {
    %c0_i32 = arith.constant 0 : i32
    %c0_i32_0 = arith.constant 0 : i32
    %c0_i32_1 = arith.constant 0 : i32
    return %c0_i32, %c0_i32_0 : i32, i32
  }
  func.func @transform_11(%arg0: i32) -> (i32, i32) {
    %c0_i32 = arith.constant 0 : i32
    %c0_i32_0 = arith.constant 0 : i32
    %c0_i32_1 = arith.constant 0 : i32
    return %c0_i32, %c0_i32_0 : i32, i32
  }
  func.func @transform_12(%arg0: i32) -> (i32, i32) {
    %c0_i32 = arith.constant 0 : i32
    %c0_i32_0 = arith.constant 0 : i32
    %c0_i32_1 = arith.constant 0 : i32
    return %c0_i32, %c0_i32_0 : i32, i32
  }
  func.func @transform_13(%arg0: i32) -> (i32, i32) {
    %c0_i32 = arith.constant 0 : i32
    %c0_i32_0 = arith.constant 0 : i32
    return %arg0, %c0_i32 : i32, i32
  }
  func.func @transform_14(%arg0: i32) -> (i32, i32) {
    %c0_i32 = arith.constant 0 : i32
    %c0_i32_0 = arith.constant 0 : i32
    return %arg0, %c0_i32 : i32, i32
  }
  func.func @transform_15(%arg0: i32) -> (i32, i32) {
    %c0_i32 = arith.constant 0 : i32
    %c0_i32_0 = arith.constant 0 : i32
    return %arg0, %c0_i32 : i32, i32
  }
}

</mosaic_0001>

<bundles_post_ra>
// kernel: tpu_custom_call.1
= control target key start
LH: loop header
LB: loop body
LE: loop exit
PB: predicated region body
PF: predicated region fallthrough
CT: control target
= control target key end

     0   :  { %21 = vsyncpa [#allocation3], 0  ;;  %s3724_s0 = inlined_call_operand.hbm [shape: f32[8,256], index: 0, kind: input, shape index: {}]   ;;  %s3725_s1 = inlined_call_operand.hbm [shape: bf16[256,512], index: 1, kind: input, shape index: {}]   ;;  %s3726_s2 = inlined_call_operand.vmem [shape: f32[1,512], index: 2, kind: input, shape index: {}]   ;;  %s3727_s3 = inlined_call_operand.hbm [shape: bf16[512,256], index: 3, kind: input, shape index: {}]   ;;  %s3728_s4 = inlined_call_operand.vmem [shape: f32[1,256], index: 4, kind: input, shape index: {}]   ;;  %s3729_s5 = inlined_call_operand.hbm [shape: bf16[256,128], index: 5, kind: input, shape index: {}]   ;;  %s3730_s6 = inlined_call_operand.hbm [shape: f32[1,128], index: 6, kind: input, shape index: {}]   ;;  %s3731_s7 = inlined_call_operand.hbm [shape: bf16[32,256], index: 7, kind: input, shape index: {}]   ;;  %s3732_s8 = inlined_call_operand.vmem [shape: f32[1,256], index: 8, kind: input, shape index: {}]   ;;  %s3733_s9 = inlined_call_operand.hbm [shape: bf16[256,512], index: 9, kind: input, shape index: {}]   ;;  %s3734_s10 = inlined_call_operand.vmem [shape: f32[1,512], index: 10, kind: input, shape index: {}]   ;;  %s3735_s11 = inlined_call_operand.hbm [shape: bf16[512,256], index: 11, kind: input, shape index: {}]   ;;  %s3736_s12 = inlined_call_operand.vmem [shape: f32[1,256], index: 12, kind: input, shape index: {}]   ;;  %s3737_s13 = inlined_call_operand.vmem [shape: f32[8,32], index: 13, kind: input, shape index: {}]   ;;  %s3738_s14 = inlined_call_operand.hbm [shape: f32[8,256], index: 14, kind: output, shape index: {0}]   ;;  %s3739_s15 = inlined_call_operand.hbm [shape: f32[8,128], index: 15, kind: output, shape index: {1}]  }
   0x1   :  { %22 = vsyncpa [#allocation6], 0 }
   0x2   :  { %23 = vsyncpa [#allocation9], 0 }
   0x3   :  { %24 = vsyncpa [#allocation12], 0 }
   0x4   :  { %25 = vsyncpa [#allocation15], 0 }
   0x5   :  { %26 = vsyncpa [#allocation4], 0 }
   0x6   :  { %27 = vsyncpa [#allocation18], 0  ;;  %s3414_s18 = smov [#allocation5]   ;;  %s3180_s22 = scalar_lea.hbm %s3725_s1, 8192 }
   0x7   :  { %s43_s19 = sshll.u32 %s3414_s18, 4  ;;  %p3181_p0 = scmp.ne.s32.totalorder %s3725_s1, %s3180_s22  ;;  %s44_s19 = int_to_ptr.vmem [resolvable:$true] %s43_s19 }
   0x8   :  { %p3184_p1 = scmp.lt.u32.totalorder %s3180_s22, %s3725_s1 }
   0xa   :  { %p3186_p2 = pnand %p3184_p1, %p3181_p0 }
   0xc   :  { %3189 = shalt.err (!%p3186_p2)
}
   0xd   :  { %s3190_s27 = scalar_lea.vmem %s44_s19, 8192  ;;  %p3195_p4 = scmp.lt.s32.totalorder %s44_s19, %s44_s19 }
   0xe   :  { %p3191_p3 = scmp.ne.s32.totalorder %s44_s19, %s3190_s27  ;;  %p3196_p5 = scmp.lt.s32.totalorder %s3190_s27, %s3190_s27 }
  0x10   :  { %p3197_p6 = por %p3196_p5, %p3195_p4 }
  0x12   :  { %p3198_p7 = pnand %p3197_p6, %p3191_p3 }
  0x14   :  { %3201 = shalt.err (!%p3198_p7)
}
  0x15   :  { %s3740_s28 = smov 256   ;;  %s3741_s29 = smov 16  }
  0x16   :  { %49 = dma.hbm_to_vmem [thread:$0]  %s3725_s1, 8192, %s44_s19, [#allocation6], %s3740_s28, %s3740_s28, %s3741_s29  }
  0x17   :  { %s3417_s17 = smov [#allocation8]   ;;  %s3202_s22 = scalar_lea.hbm %s3729_s5, 2048 }
  0x18   :  { %s71_s18 = sshll.u32 %s3417_s17, 4  ;;  %p3203_p8 = scmp.ne.s32.totalorder %s3729_s5, %s3202_s22  ;;  %s72_s18 = int_to_ptr.vmem [resolvable:$true] %s71_s18 }
  0x19   :  { %p3206_p9 = scmp.lt.u32.totalorder %s3202_s22, %s3729_s5 }
  0x1b   :  { %p3208_p10 = pnand %p3206_p9, %p3203_p8 }
  0x1d   :  { %3211 = shalt.err (!%p3208_p10)
}
  0x1e   :  { %s3212_s27 = scalar_lea.vmem %s72_s18, 2048  ;;  %p3217_p12 = scmp.lt.s32.totalorder %s72_s18, %s72_s18 }
  0x1f   :  { %p3213_p11 = scmp.ne.s32.totalorder %s72_s18, %s3212_s27  ;;  %p3218_p13 = scmp.lt.s32.totalorder %s3212_s27, %s3212_s27 }
  0x21   :  { %p3219_p0 = por %p3218_p13, %p3217_p12 }
  0x23   :  { %p3220_p1 = pnand %p3219_p0, %p3213_p11 }
  0x25   :  { %3223 = shalt.err (!%p3220_p1)
}
  0x26   :  { %s3418_s1 = smov 64   ;;  %s3419_s19 = smov 4  }
  0x27   :  { %77 = dma.hbm_to_vmem [thread:$0]  %s3729_s5, 2048, %s72_s18, [#allocation9], %s3418_s1, %s3418_s1, %s3419_s19  }
  0x28   :  { %s3420_s17 = smov [#allocation11]   ;;  %s3421_s21 = smov [#allocation2]  }
  0x29   :  { %s93_s20 = sshll.u32 %s3420_s17, 4  ;;  %s34_s23 = sshll.u32 %s3421_s21, 4  ;;  %s94_s20 = int_to_ptr.vmem [resolvable:$true] %s93_s20  ;;  %s35_s23 = int_to_ptr.vmem [resolvable:$true] %s34_s23 }
  0x2a   :  { %s3224_s25 = scalar_lea.hbm %s3731_s7, 512 }
  0x2b   :  { %p3225_p2 = scmp.ne.s32.totalorder %s3731_s7, %s3224_s25  ;;  %p3228_p3 = scmp.lt.u32.totalorder %s3224_s25, %s3731_s7 }
  0x2d   :  { %p3230_p4 = pnand %p3228_p3, %p3225_p2 }
  0x2f   :  { %3233 = shalt.err (!%p3230_p4)
}
  0x30   :  { %s3234_s5 = scalar_lea.vmem %s94_s20, 512  ;;  %p3239_p6 = scmp.lt.s32.totalorder %s94_s20, %s94_s20 }
  0x31   :  { %p3235_p5 = scmp.ne.s32.totalorder %s94_s20, %s3234_s5  ;;  %p3240_p7 = scmp.lt.s32.totalorder %s3234_s5, %s3234_s5 }
  0x33   :  { %p3241_p8 = por %p3240_p7, %p3239_p6 }
  0x35   :  { %p3242_p9 = pnand %p3241_p8, %p3235_p5 }
  0x37   :  { %3245 = shalt.err (!%p3242_p9)
}
  0x38   :  { %s3422_s18 = smov 128   ;;  %s3423_s1 = smov 8  }
  0x39   :  { %99 = dma.hbm_to_vmem [thread:$0]  %s3731_s7, 512, %s94_s20, [#allocation12], %s3422_s18, %s3422_s18, %s3423_s1  }
  0x3a   :  { %s3246_s16 = scalar_lea.hbm %s3724_s0, 256 }
  0x3b   :  { %p3247_p10 = scmp.ne.s32.totalorder %s3724_s0, %s3246_s16  ;;  %p3250_p11 = scmp.lt.u32.totalorder %s3246_s16, %s3724_s0 }
  0x3d   :  { %p3252_p12 = pnand %p3250_p11, %p3247_p10 }
  0x3f   :  { %3255 = shalt.err (!%p3252_p12)
}
  0x40   :  { %s3256_s25 = scalar_lea.vmem %s35_s23, 256  ;;  %p3261_p0 = scmp.lt.s32.totalorder %s35_s23, %s35_s23 }
  0x41   :  { %p3257_p13 = scmp.ne.s32.totalorder %s35_s23, %s3256_s25  ;;  %p3262_p1 = scmp.lt.s32.totalorder %s3256_s25, %s3256_s25 }
  0x43   :  { %p3263_p2 = por %p3262_p1, %p3261_p0 }
  0x45   :  { %p3264_p3 = pnand %p3263_p2, %p3257_p13 }
  0x47   :  { %3267 = shalt.err (!%p3264_p3)
}
  0x48   :  { %37 = dma.hbm_to_vmem [thread:$0]  %s3724_s0, 256, %s35_s23, [#allocation3]  }
  0x49   :  { %s3424_s26 = smov [#allocation7]   ;;  %s3425_s5 = smov [#allocation10]  }
  0x4a   :  { %s57_s27 = sshll.u32 %s3424_s26, 4  ;;  %s84_s19 = sshll.u32 %s3425_s5, 4  ;;  %s58_s27 = int_to_ptr.vmem [resolvable:$true] %s57_s27  ;;  %s85_s19 = int_to_ptr.vmem [resolvable:$true] %s84_s19 }
  0x4b   :  { %s3268_s29 = scalar_lea.hbm %s3727_s3, 8192 }
  0x4c   :  { %p3269_p4 = scmp.ne.s32.totalorder %s3727_s3, %s3268_s29  ;;  %p3272_p5 = scmp.lt.u32.totalorder %s3268_s29, %s3727_s3 }
  0x4e   :  { %p3274_p6 = pnand %p3272_p5, %p3269_p4 }
  0x50   :  { %3277 = shalt.err (!%p3274_p6)
}
  0x51   :  { %s3278_s0 = scalar_lea.vmem %s58_s27, 8192  ;;  %p3283_p8 = scmp.lt.s32.totalorder %s58_s27, %s58_s27 }
  0x52   :  { %p3279_p7 = scmp.ne.s32.totalorder %s58_s27, %s3278_s0  ;;  %p3284_p9 = scmp.lt.s32.totalorder %s3278_s0, %s3278_s0 }
  0x54   :  { %p3285_p10 = por %p3284_p9, %p3283_p8 }
  0x56   :  { %p3286_p11 = pnand %p3285_p10, %p3279_p7 }
  0x58   :  { %3289 = shalt.err (!%p3286_p11)
}
  0x59   :  { %63 = dma.hbm_to_vmem [thread:$0]  %s3727_s3, 8192, %s58_s27, [#allocation6], %s3422_s18, %s3422_s18, %s3423_s1  }
  0x5a   :  { %s3290_s20 = scalar_lea.hbm %s3730_s6, 16 }
  0x5b   :  { %p3291_p12 = scmp.ne.s32.totalorder %s3730_s6, %s3290_s20  ;;  %p3294_p13 = scmp.lt.u32.totalorder %s3290_s20, %s3730_s6 }
  0x5d   :  { %p3296_p0 = pnand %p3294_p13, %p3291_p12 }
  0x5f   :  { %3299 = shalt.err (!%p3296_p0)
}
  0x60   :  { %s3300_s29 = scalar_lea.vmem %s85_s19, 16  ;;  %s3304_s16 = scalar_lea.vmem %s85_s19, 32 }
  0x61   :  { %p3301_p1 = scmp.ne.s32.totalorder %s85_s19, %s3300_s29  ;;  %p3305_p2 = scmp.lt.s32.totalorder %s85_s19, %s85_s19 }
  0x62   :  { %p3306_p3 = scmp.lt.s32.totalorder %s3304_s16, %s3300_s29 }
  0x64   :  { %p3307_p4 = por %p3306_p3, %p3305_p2 }
  0x66   :  { %p3308_p5 = pnand %p3307_p4, %p3301_p1 }
  0x68   :  { %3311 = shalt.err (!%p3308_p5)
}
  0x69   :  { %87 = dma.hbm_to_vmem [thread:$0]  %s3730_s6, 16, %s85_s19, [#allocation9]  }
  0x6a   :  { %s3426_s17 = smov [#allocation13]   ;;  %s3427_s22 = smov [#allocation14]  }
  0x6b   :  { %s107_s21 = sshll.u32 %s3426_s17, 4  ;;  %s121_s0 = sshll.u32 %s3427_s22, 4  ;;  %s108_s21 = int_to_ptr.vmem [resolvable:$true] %s107_s21  ;;  %s3593_s0 = int_to_ptr.vmem [resolvable:$true] %s121_s0 }
  0x6c   :  { %s3312_s25 = scalar_lea.hbm %s3733_s9, 8192 }
  0x6d   :  { %p3313_p6 = scmp.ne.s32.totalorder %s3733_s9, %s3312_s25  ;;  %p3316_p7 = scmp.lt.u32.totalorder %s3312_s25, %s3733_s9 }
  0x6f   :  { %p3318_p8 = pnand %p3316_p7, %p3313_p6 }
  0x71   :  { %3321 = shalt.err (!%p3318_p8)
}
  0x72   :  { %s3322_s6 = scalar_lea.vmem %s108_s21, 8192  ;;  %p3327_p10 = scmp.lt.s32.totalorder %s108_s21, %s108_s21 }
  0x73   :  { %p3323_p9 = scmp.ne.s32.totalorder %s108_s21, %s3322_s6  ;;  %p3328_p11 = scmp.lt.s32.totalorder %s3322_s6, %s3322_s6 }
  0x75   :  { %p3329_p12 = por %p3328_p11, %p3327_p10 }
  0x77   :  { %p3330_p13 = pnand %p3329_p12, %p3323_p9 }
  0x79   :  { %3333 = shalt.err (!%p3330_p13)
}
  0x7a   :  { %s3742_s19 = smov 16   ;;  %s3743_s30 = smov 256  }
  0x7b   :  { %113 = dma.hbm_to_vmem [thread:$0]  %s3733_s9, 8192, %s108_s21, [#allocation12], %s3743_s30, %s3743_s30, %s3742_s19  }
  0x7c   :  { %s3334_s27 = scalar_lea.hbm %s3735_s11, 8192 }
  0x7d   :  { %p3335_p0 = scmp.ne.s32.totalorder %s3735_s11, %s3334_s27  ;;  %p3338_p1 = scmp.lt.u32.totalorder %s3334_s27, %s3735_s11 }
  0x7f   :  { %p3340_p2 = pnand %p3338_p1, %p3335_p0 }
  0x81   :  { %3343 = shalt.err (!%p3340_p2)
}
  0x82   :  { %s3344_s25 = scalar_lea.vmem %s3593_s0, 8192  ;;  %p3349_p4 = scmp.lt.s32.totalorder %s3593_s0, %s3593_s0 }
  0x83   :  { %p3345_p3 = scmp.ne.s32.totalorder %s3593_s0, %s3344_s25  ;;  %p3350_p5 = scmp.lt.s32.totalorder %s3344_s25, %s3344_s25 }
  0x85   :  { %p3351_p6 = por %p3350_p5, %p3349_p4 }
  0x87   :  { %p3352_p7 = pnand %p3351_p6, %p3345_p3 }
  0x89   :  { %3355 = shalt.err (!%p3352_p7)
}
  0x8a   :  { %127 = dma.hbm_to_vmem [thread:$0]  %s3735_s11, 8192, %s3593_s0, [#allocation15], %s3422_s18, %s3422_s18, %s3423_s1  }
  0x8b   :  { %3400 = dma.done.wait [#allocation3], 256  }
  0x8c   :  { %3401 = vsyncadd [#allocation3], 4294967040 }
  0x8d   :  { %3402 = dma.done.wait [#allocation6], 16384  }
  0x8e   :  { %3403 = vsyncadd [#allocation6], 4294950912 }
  0x8f   :  { %3404 = dma.done.wait [#allocation9], 2064  }
  0x90   :  { %3405 = vsyncadd [#allocation9], 4294965232 }
  0x91   :  { %3406 = dma.done.wait [#allocation12], 8704  }
  0x92   :  { %3407 = vsyncadd [#allocation12], 4294958592 }
  0x93   :  { %3408 = dma.done.wait [#allocation15], 8192  }
  0x94   :  { %3409 = vsyncadd [#allocation15], 4294959104  ;;  %v2764_v0 = vld [vmem:[#allocation5 + $0x4] ss:$16 sps:$4 sm:$0xff]   ;;  %v2766_v1 = vld [vmem:[#allocation5] ss:$16 sps:$4 sm:$0xff]  }
  0x95   :  { %567 = vmatprep.subr.bf16.mxu1 %v2764_v0  ;;  %v2767_v2 = vld [vmem:[#allocation5 + $0x24] ss:$16 sps:$4 sm:$0xff]   ;;  %v2769_v3 = vld [vmem:[#allocation5 + $0x20] ss:$16 sps:$4 sm:$0xff]   ;;  %v158_v13 = vld [vmem:[#allocation2 + $0x8] sm:$0xff]  ;;  %vm1361_vm0 = vcmask 261120  }
  0x96   :  { %568 = vmatpush1.bf16.msra.mxu1 %v2766_v1  ;;  %v2770_v4 = vld [vmem:[#allocation5 + $0x44] ss:$16 sps:$4 sm:$0xff]   ;;  %v2772_v5 = vld [vmem:[#allocation5 + $0x40] ss:$16 sps:$4 sm:$0xff]   ;;  %v3630_v14 = vpack.c.bf16 %v158_v13, %v158_v13  ;;  %v2814_v45 = vld [vmem:[#allocation5 + $0xc] ss:$16 sps:$4 sm:$0xff]  }
  0x97   :  { %569 = vmatprep.subr.bf16.mxu1 %v2767_v2  ;;  %v2773_v6 = vld [vmem:[#allocation5 + $0x64] ss:$16 sps:$4 sm:$0xff]   ;;  %v2775_v7 = vld [vmem:[#allocation5 + $0x60] ss:$16 sps:$4 sm:$0xff]   ;;  %v2812_v47 = vld [vmem:[#allocation5 + $0x8] ss:$16 sps:$4 sm:$0xff]  }
  0x98   :  { %v2776_v8 = vld [vmem:[#allocation5 + $0x84] ss:$16 sps:$4 sm:$0xff]   ;;  %v2778_v9 = vld [vmem:[#allocation5 + $0x80] ss:$16 sps:$4 sm:$0xff]   ;;  %599 = vmatprep.mubr.bf16.mxu1 %v3630_v14  ;;  %v2817_v49 = vld [vmem:[#allocation5 + $0x2c] ss:$16 sps:$4 sm:$0xff]  }
  0x99   :  { %v2779_v10 = vld [vmem:[#allocation5 + $0xa4] ss:$16 sps:$4 sm:$0xff]   ;;  %v2781_v11 = vld [vmem:[#allocation5 + $0xa0] ss:$16 sps:$4 sm:$0xff]   ;;  %v2815_v52 = vld [vmem:[#allocation5 + $0x28] ss:$16 sps:$4 sm:$0xff]  }
  0x9a   :  { %570 = vmatpush1.bf16.msra.mxu1 %v2769_v3  ;;  %v2782_v12 = vld [vmem:[#allocation5 + $0xc4] ss:$16 sps:$4 sm:$0xff]   ;;  %v2784_v15 = vld [vmem:[#allocation5 + $0xc0] ss:$16 sps:$4 sm:$0xff]   ;;  %v2820_v53 = vld [vmem:[#allocation5 + $0x4c] ss:$16 sps:$4 sm:$0xff]  }
  0x9b   :  { %571 = vmatprep.subr.bf16.mxu1 %v2770_v4  ;;  %v2785_v16 = vld [vmem:[#allocation5 + $0xe4] ss:$16 sps:$4 sm:$0xff]   ;;  %v2787_v17 = vld [vmem:[#allocation5 + $0xe0] ss:$16 sps:$4 sm:$0xff]   ;;  %v2818_v56 = vld [vmem:[#allocation5 + $0x48] ss:$16 sps:$4 sm:$0xff]  }
  0x9c   :  { %v2788_v18 = vld [vmem:[#allocation5 + $0x104] ss:$16 sps:$4 sm:$0xff]   ;;  %v2790_v19 = vld [vmem:[#allocation5 + $0x100] ss:$16 sps:$4 sm:$0xff]   ;;  %v2823_v57 = vld [vmem:[#allocation5 + $0x6c] ss:$16 sps:$4 sm:$0xff]  }
  0x9d   :  { %v2791_v20 = vld [vmem:[#allocation5 + $0x124] ss:$16 sps:$4 sm:$0xff]   ;;  %v2793_v21 = vld [vmem:[#allocation5 + $0x120] ss:$16 sps:$4 sm:$0xff]   ;;  %v2821_v60 = vld [vmem:[#allocation5 + $0x68] ss:$16 sps:$4 sm:$0xff]  }
  0x9e   :  { %572 = vmatpush1.bf16.msra.mxu1 %v2772_v5  ;;  %v2794_v22 = vld [vmem:[#allocation5 + $0x144] ss:$16 sps:$4 sm:$0xff]   ;;  %v2796_v23 = vld [vmem:[#allocation5 + $0x140] ss:$16 sps:$4 sm:$0xff]   ;;  %v2826_v61 = vld [vmem:[#allocation5 + $0x8c] ss:$16 sps:$4 sm:$0xff]  }
  0x9f   :  { %573 = vmatprep.subr.bf16.mxu1 %v2773_v6  ;;  %v2797_v24 = vld [vmem:[#allocation5 + $0x164] ss:$16 sps:$4 sm:$0xff]   ;;  %v2799_v25 = vld [vmem:[#allocation5 + $0x160] ss:$16 sps:$4 sm:$0xff]   ;;  %v2824_v0 = vld [vmem:[#allocation5 + $0x88] ss:$16 sps:$4 sm:$0xff]  }
  0xa0   :  { %v2800_v26 = vld [vmem:[#allocation5 + $0x184] ss:$16 sps:$4 sm:$0xff]   ;;  %v2862_v28 = vld [vmem:[#allocation7] ss:$8 sps:$4 sm:$0xff]   ;;  %v2865_v31 = vld [vmem:[#allocation7 + $0x10] ss:$8 sps:$4 sm:$0xff]  }
  0xa1   :  { %v2860_v27 = vld [vmem:[#allocation7 + $0x4] ss:$8 sps:$4 sm:$0xff]   ;;  %v2863_v29 = vld [vmem:[#allocation7 + $0x14] ss:$8 sps:$4 sm:$0xff]   ;;  %v2802_v30 = vld [vmem:[#allocation5 + $0x180] ss:$16 sps:$4 sm:$0xff]  }
  0xa2   :  { %574 = vmatpush1.bf16.msra.mxu1 %v2775_v7  ;;  %1053 = vmatprep.subr.bf16.mxu0 %v2860_v27  ;;  %v2803_v32 = vld [vmem:[#allocation5 + $0x1a4] ss:$16 sps:$4 sm:$0xff]   ;;  %v2805_v34 = vld [vmem:[#allocation5 + $0x1a0] ss:$16 sps:$4 sm:$0xff]   ;;  %v2829_v1 = vld [vmem:[#allocation5 + $0xac] ss:$16 sps:$4 sm:$0xff]  }
  0xa3   :  { %575 = vmatprep.subr.bf16.mxu1 %v2776_v8  ;;  %1054 = vmatpush1.bf16.msra.mxu0 %v2862_v28  ;;  %v2866_v33 = vld [vmem:[#allocation7 + $0x24] ss:$8 sps:$4 sm:$0xff]   ;;  %v2868_v35 = vld [vmem:[#allocation7 + $0x20] ss:$8 sps:$4 sm:$0xff]   ;;  %v2869_v37 = vld [vmem:[#allocation7 + $0x34] ss:$8 sps:$4 sm:$0xff]  }
  0xa4   :  { %1055 = vmatprep.subr.bf16.mxu0 %v2863_v29  ;;  %v2806_v36 = vld [vmem:[#allocation5 + $0x1c4] ss:$16 sps:$4 sm:$0xff]   ;;  %v2808_v38 = vld [vmem:[#allocation5 + $0x1c0] ss:$16 sps:$4 sm:$0xff]   ;;  %v2827_v4 = vld [vmem:[#allocation5 + $0xa8] ss:$16 sps:$4 sm:$0xff]  }
  0xa5   :  { %v2871_v39 = vld [vmem:[#allocation7 + $0x30] ss:$8 sps:$4 sm:$0xff]   ;;  %v2809_v40 = vld [vmem:[#allocation5 + $0x1e4] ss:$16 sps:$4 sm:$0xff]   ;;  %v2874_v44 = vld [vmem:[#allocation7 + $0x40] ss:$8 sps:$4 sm:$0xff]  }
  0xa6   :  { %576 = vmatpush1.bf16.msra.mxu1 %v2778_v9  ;;  %v2872_v41 = vld [vmem:[#allocation7 + $0x44] ss:$8 sps:$4 sm:$0xff]   ;;  %v2811_v42 = vld [vmem:[#allocation5 + $0x1e0] ss:$16 sps:$4 sm:$0xff]   ;;  %v2875_v46 = vld [vmem:[#allocation7 + $0x54] ss:$8 sps:$4 sm:$0xff]  }
  0xa7   :  { %577 = vmatprep.subr.bf16.mxu1 %v2779_v10  ;;  %1056 = vmatpush1.bf16.msra.mxu0 %v2865_v31  ;;  %v157_v43 = vld [vmem:[#allocation2] sm:$0xff]  ;;  %v2878_v51 = vld [vmem:[#allocation7 + $0x64] ss:$8 sps:$4 sm:$0xff]   ;;  %v2880_v54 = vld [vmem:[#allocation7 + $0x60] ss:$8 sps:$4 sm:$0xff]  }
  0xa8   :  { %1057 = vmatprep.subr.bf16.mxu0 %v2866_v33  ;;  %v3633_v48 = vpack.c.bf16 %v157_v43, %v157_v43  ;;  %v2877_v50 = vld [vmem:[#allocation7 + $0x50] ss:$8 sps:$4 sm:$0xff]   ;;  %v2881_v55 = vld [vmem:[#allocation7 + $0x74] ss:$8 sps:$4 sm:$0xff]   ;;  %v2884_v59 = vld [vmem:[#allocation7 + $0x84] ss:$8 sps:$4 sm:$0xff]  }
  0xa9   :  { %v2883_v58 = vld [vmem:[#allocation7 + $0x70] ss:$8 sps:$4 sm:$0xff]   ;;  %v2886_v62 = vld [vmem:[#allocation7 + $0x80] ss:$8 sps:$4 sm:$0xff]   ;;  %v2887_v63 = vld [vmem:[#allocation7 + $0x94] ss:$8 sps:$4 sm:$0xff]  }
  0xaa   :  { %578 = vmatpush1.bf16.msra.mxu1 %v2781_v11  ;;  %v2889_v2 = vld [vmem:[#allocation7 + $0x90] ss:$8 sps:$4 sm:$0xff]   ;;  %v2890_v3 = vld [vmem:[#allocation7 + $0xa4] ss:$8 sps:$4 sm:$0xff]   ;;  %v2892_v6 = vld [vmem:[#allocation7 + $0xa0] ss:$8 sps:$4 sm:$0xff]  }
  0xab   :  { %579 = vmatprep.subr.bf16.mxu1 %v2782_v12  ;;  %1058 = vmatpush1.bf16.msra.mxu0 %v2868_v35  ;;  %v2832_v5 = vld [vmem:[#allocation5 + $0xcc] ss:$16 sps:$4 sm:$0xff]   ;;  %v2830_v8 = vld [vmem:[#allocation5 + $0xc8] ss:$16 sps:$4 sm:$0xff]  }
  0xac   :  { %1059 = vmatprep.subr.bf16.mxu0 %v2869_v37  ;;  %v2893_v7 = vld [vmem:[#allocation7 + $0xb4] ss:$8 sps:$4 sm:$0xff]   ;;  %v2895_v10 = vld [vmem:[#allocation7 + $0xb0] ss:$8 sps:$4 sm:$0xff]   ;;  %v2896_v11 = vld [vmem:[#allocation7 + $0xc4] ss:$8 sps:$4 sm:$0xff]   ;;  %v227_v37 = vlaneseq }
  0xad   :  { %v2835_v9 = vld [vmem:[#allocation5 + $0xec] ss:$16 sps:$4 sm:$0xff]   ;;  %v2833_v12 = vld [vmem:[#allocation5 + $0xe8] ss:$16 sps:$4 sm:$0xff]  }
  0xae   :  { %580 = vmatpush1.bf16.msra.mxu1 %v2784_v15  ;;  %v2838_v13 = vld [vmem:[#allocation5 + $0x10c] ss:$16 sps:$4 sm:$0xff]   ;;  %v2851_v27 = vld [vmem:[#allocation5 + $0x1a8] ss:$16 sps:$4 sm:$0xff]  }
  0xaf   :  { %581 = vmatprep.subr.bf16.mxu1 %v2785_v16  ;;  %1060 = vmatpush1.bf16.msra.mxu0 %v2871_v39  ;;  %v2899_v15 = vld [vmem:[#allocation7 + $0xd4] ss:$8 sps:$4 sm:$0xff]   ;;  %v2836_v16 = vld [vmem:[#allocation5 + $0x108] ss:$16 sps:$4 sm:$0xff]  }
  0xb0   :  { %1061 = vmatprep.subr.bf16.mxu0 %v2872_v41  ;;  %v2856_v28 = vld [vmem:[#allocation5 + $0x1cc] ss:$16 sps:$4 sm:$0xff]   ;;  %v2854_v29 = vld [vmem:[#allocation5 + $0x1c8] ss:$16 sps:$4 sm:$0xff]  }
  0xb1   :  { %v2857_v31 = vld [vmem:[#allocation5 + $0x1e8] ss:$16 sps:$4 sm:$0xff]  }
  0xb2   :  { %582 = vmatpush1.bf16.msra.mxu1 %v2787_v17  ;;  %v2841_v17 = vld [vmem:[#allocation5 + $0x12c] ss:$16 sps:$4 sm:$0xff]   ;;  %v2904_v33 = vld [vmem:[#allocation7 + $0xe0] ss:$8 sps:$4 sm:$0xff]   ;;  %v2907_v35 = vld [vmem:[#allocation7 + $0xf0] ss:$8 sps:$4 sm:$0xff]  }
  0xb3   :  { %583 = vmatprep.subr.bf16.mxu1 %v2788_v18  ;;  %1062 = vmatpush1.bf16.msra.mxu0 %v2874_v44  ;;  %v2901_v18 = vld [vmem:[#allocation7 + $0xd0] ss:$8 sps:$4 sm:$0xff]  }
  0xb4   :  { %1063 = vmatprep.subr.bf16.mxu0 %v2875_v46 }
  0xb6   :  { %584 = vmatpush1.bf16.msra.mxu1 %v2790_v19  ;;  %v2839_v19 = vld [vmem:[#allocation5 + $0x128] ss:$16 sps:$4 sm:$0xff]  }
  0xb7   :  { %585 = vmatprep.subr.bf16.mxu1 %v2791_v20  ;;  %1064 = vmatpush1.bf16.msra.mxu0 %v2877_v50  ;;  %v2844_v20 = vld [vmem:[#allocation5 + $0x14c] ss:$16 sps:$4 sm:$0xff]  }
  0xb8   :  { %1065 = vmatprep.subr.bf16.mxu0 %v2878_v51 }
  0xba   :  { %586 = vmatpush1.bf16.msra.mxu1 %v2793_v21  ;;  %v2842_v21 = vld [vmem:[#allocation5 + $0x148] ss:$16 sps:$4 sm:$0xff]  }
  0xbb   :  { %587 = vmatprep.subr.bf16.mxu1 %v2794_v22  ;;  %1066 = vmatpush1.bf16.msra.mxu0 %v2880_v54  ;;  %v2847_v22 = vld [vmem:[#allocation5 + $0x16c] ss:$16 sps:$4 sm:$0xff]   ;;  %v2908_v54 = vld [vmem:[#allocation7 + $0x100] ss:$8 sps:$4 sm:$0xff]  }
  0xbc   :  { %1067 = vmatprep.subr.bf16.mxu0 %v2881_v55  ;;  %v2913_v55 = vld [vmem:[#allocation7 + $0x114] ss:$8 sps:$4 sm:$0xff]  }
  0xbe   :  { %588 = vmatpush1.bf16.msra.mxu1 %v2796_v23  ;;  %v2845_v23 = vld [vmem:[#allocation5 + $0x168] ss:$16 sps:$4 sm:$0xff]  }
  0xbf   :  { %589 = vmatprep.subr.bf16.mxu1 %v2797_v24  ;;  %1068 = vmatpush1.bf16.msra.mxu0 %v2883_v58  ;;  %v2850_v24 = vld [vmem:[#allocation5 + $0x18c] ss:$16 sps:$4 sm:$0xff]   ;;  %v2914_v58 = vld [vmem:[#allocation7 + $0x120] ss:$8 sps:$4 sm:$0xff]  }
  0xc0   :  { %1069 = vmatprep.subr.bf16.mxu0 %v2884_v59  ;;  %v2919_v59 = vld [vmem:[#allocation7 + $0x134] ss:$8 sps:$4 sm:$0xff]  }
  0xc2   :  { %590 = vmatpush1.bf16.msra.mxu1 %v2799_v25  ;;  %v2848_v25 = vld [vmem:[#allocation5 + $0x188] ss:$16 sps:$4 sm:$0xff]  }
  0xc3   :  { %591 = vmatprep.subr.bf16.mxu1 %v2800_v26  ;;  %1070 = vmatpush1.bf16.msra.mxu0 %v2886_v62  ;;  %v2853_v26 = vld [vmem:[#allocation5 + $0x1ac] ss:$16 sps:$4 sm:$0xff]   ;;  %v2920_v62 = vld [vmem:[#allocation7 + $0x140] ss:$8 sps:$4 sm:$0xff]  }
  0xc4   :  { %1071 = vmatprep.subr.bf16.mxu0 %v2887_v63  ;;  %v2925_v63 = vld [vmem:[#allocation7 + $0x154] ss:$8 sps:$4 sm:$0xff]  }
  0xc6   :  { %592 = vmatpush1.bf16.msra.mxu1 %v2802_v30  ;;  %v2859_v30 = vld [vmem:[#allocation5 + $0x1ec] ss:$16 sps:$4 sm:$0xff]  }
  0xc7   :  { %593 = vmatprep.subr.bf16.mxu1 %v2803_v32  ;;  %1072 = vmatpush1.bf16.msra.mxu0 %v2889_v2  ;;  %v2902_v32 = vld [vmem:[#allocation7 + $0xe4] ss:$8 sps:$4 sm:$0xff]   ;;  %v2926_v2 = vld [vmem:[#allocation7 + $0x160] ss:$8 sps:$4 sm:$0xff]  }
  0xc8   :  { %1073 = vmatprep.subr.bf16.mxu0 %v2890_v3  ;;  %v2931_v3 = vld [vmem:[#allocation7 + $0x174] ss:$8 sps:$4 sm:$0xff]  }
  0xca   :  { %594 = vmatpush1.bf16.msra.mxu1 %v2805_v34  ;;  %v2905_v34 = vld [vmem:[#allocation7 + $0xf4] ss:$8 sps:$4 sm:$0xff]  }
  0xcb   :  { %595 = vmatprep.subr.bf16.mxu1 %v2806_v36  ;;  %1074 = vmatpush1.bf16.msra.mxu0 %v2892_v6  ;;  %v2910_v36 = vld [vmem:[#allocation7 + $0x104] ss:$8 sps:$4 sm:$0xff]   ;;  %v2932_v6 = vld [vmem:[#allocation7 + $0x180] ss:$8 sps:$4 sm:$0xff]  }
  0xcc   :  { %1075 = vmatprep.subr.bf16.mxu0 %v2893_v7  ;;  %v2937_v7 = vld [vmem:[#allocation7 + $0x194] ss:$8 sps:$4 sm:$0xff]  }
  0xce   :  { %596 = vmatpush1.bf16.msra.mxu1 %v2808_v38  ;;  %v3638_v38 = vshrl.u32 %v227_v37, 7  ;;  %v2958_v37 = vld [vmem:[#allocation8 + $0x48] sm:$0xff]  }
  0xcf   :  { %597 = vmatprep.subr.bf16.mxu1 %v2809_v40  ;;  %1076 = vmatpush1.bf16.msra.mxu0 %v2895_v10  ;;  %v3646_v40 = vld [vmem:[%s3726_s2] sm:$0xf]  ;;  %v2938_v10 = vld [vmem:[#allocation7 + $0x1a0] ss:$8 sps:$4 sm:$0xff]  }
  0xd0   :  { %1077 = vmatprep.subr.bf16.mxu0 %v2896_v11  ;;  %v3641_v39 = vsub.s32 0, %v3638_v38  ;;  %v3649_v41 = vsub.s32 1, %v3638_v38  ;;  %v2943_v11 = vld [vmem:[#allocation7 + $0x1b4] ss:$8 sps:$4 sm:$0xff]  }
  0xd2   :  { %598 = vmatpush1.bf16.msra.mxu1 %v2811_v42  ;;  %v230_v42 = vrot.slane %v3646_v40, %v3641_v39  ;;  %v234_v43 = vrot.slane %v3646_v40, %v3649_v41 }
  0xd3   :  { %608 = vmatprep.subr.bf16.mxu1 %v2814_v45 }
  0xd5   :  { %600 = vmatmul.mubr.bf16.vlgmr.msra.gmra.mrb[0].mxu1 %v3633_v48 }
  0xd6   :  { %609 = vmatpush1.bf16.msra.mxu1 %v2812_v47  ;;  %640 = vmatprep.mubr.bf16.mxu1 %v3630_v14  ;;  %v2898_v14 = vld [vmem:[#allocation7 + $0xc0] ss:$8 sps:$4 sm:$0xff]  }
  0xd7   :  { %610 = vmatprep.subr.bf16.mxu1 %v2817_v49  ;;  %1078 = vmatpush1.bf16.msra.mxu0 %v2898_v14  ;;  %v2944_v14 = vld [vmem:[#allocation7 + $0x1c0] ss:$8 sps:$4 sm:$0xff]  }
  0xd8   :  { %1079 = vmatprep.subr.bf16.mxu0 %v2899_v15  ;;  %v2949_v15 = vld [vmem:[#allocation7 + $0x1d4] ss:$8 sps:$4 sm:$0xff]  }
  0xda   :  { %611 = vmatpush1.bf16.msra.mxu1 %v2815_v52 }
  0xdb   :  { %612 = vmatprep.subr.bf16.mxu1 %v2820_v53  ;;  %1080 = vmatpush1.bf16.msra.mxu0 %v2901_v18  ;;  %v241_v18 = vsub.s32 3, %v3638_v38 }
  0xdc   :  { %1081 = vmatprep.subr.bf16.mxu0 %v2902_v32  ;;  %v2956_v32 = vld [vmem:[#allocation8 + $0x40] sm:$0xff]  }
  0xde   :  { %613 = vmatpush1.bf16.msra.mxu1 %v2818_v56  ;;  %v2911_v56 = vld [vmem:[#allocation7 + $0x110] ss:$8 sps:$4 sm:$0xff]  }
  0xdf   :  { %614 = vmatprep.subr.bf16.mxu1 %v2823_v57  ;;  %1082 = vmatpush1.bf16.msra.mxu0 %v2904_v33  ;;  %v2916_v57 = vld [vmem:[#allocation7 + $0x124] ss:$8 sps:$4 sm:$0xff]  }
  0xe0   :  { %1083 = vmatprep.subr.bf16.mxu0 %v2905_v34 }
  0xe2   :  { %615 = vmatpush1.bf16.msra.mxu1 %v2821_v60  ;;  %v2917_v60 = vld [vmem:[#allocation7 + $0x130] ss:$8 sps:$4 sm:$0xff]  }
  0xe3   :  { %616 = vmatprep.subr.bf16.mxu1 %v2826_v61  ;;  %1084 = vmatpush1.bf16.msra.mxu0 %v2907_v35  ;;  %v2922_v61 = vld [vmem:[#allocation7 + $0x144] ss:$8 sps:$4 sm:$0xff]  }
  0xe4   :  { %1094 = vmatprep.subr.bf16.mxu0 %v2910_v36  ;;  %v2957_v35 = vld [vmem:[#allocation8] sm:$0xff]  }
  0xe6   :  { %617 = vmatpush1.bf16.msra.mxu1 %v2824_v0  ;;  %v2923_v0 = vld [vmem:[#allocation7 + $0x150] ss:$8 sps:$4 sm:$0xff]  }
  0xe7   :  { %618 = vmatprep.subr.bf16.mxu1 %v2829_v1  ;;  %v2928_v1 = vld [vmem:[#allocation7 + $0x164] ss:$8 sps:$4 sm:$0xff]  }
  0xea   :  { %619 = vmatpush1.bf16.msra.mxu1 %v2827_v4  ;;  %v2929_v4 = vld [vmem:[#allocation7 + $0x170] ss:$8 sps:$4 sm:$0xff]  }
  0xeb   :  { %620 = vmatprep.subr.bf16.mxu1 %v2832_v5  ;;  %v2934_v5 = vld [vmem:[#allocation7 + $0x184] ss:$8 sps:$4 sm:$0xff]  }
  0xee   :  { %621 = vmatpush1.bf16.msra.mxu1 %v2830_v8  ;;  %v2935_v8 = vld [vmem:[#allocation7 + $0x190] ss:$8 sps:$4 sm:$0xff]  }
  0xef   :  { %622 = vmatprep.subr.bf16.mxu1 %v2835_v9  ;;  %v2940_v9 = vld [vmem:[#allocation7 + $0x1a4] ss:$8 sps:$4 sm:$0xff]  }
  0xf2   :  { %623 = vmatpush1.bf16.msra.mxu1 %v2833_v12  ;;  %v2941_v12 = vld [vmem:[#allocation7 + $0x1b0] ss:$8 sps:$4 sm:$0xff]  }
  0xf3   :  { %624 = vmatprep.subr.bf16.mxu1 %v2838_v13  ;;  %v2946_v13 = vld [vmem:[#allocation7 + $0x1c4] ss:$8 sps:$4 sm:$0xff]  }
  0xf6   :  { %625 = vmatpush1.bf16.msra.mxu1 %v2836_v16  ;;  %v237_v16 = vsub.s32 2, %v3638_v38 }
  0xf7   :  { %626 = vmatprep.subr.bf16.mxu1 %v2841_v17  ;;  %v2947_v17 = vld [vmem:[#allocation7 + $0x1d0] ss:$8 sps:$4 sm:$0xff]  }
  0xfa   :  { %627 = vmatpush1.bf16.msra.mxu1 %v2839_v19  ;;  %v2952_v19 = vld [vmem:[#allocation7 + $0x1e4] ss:$8 sps:$4 sm:$0xff]  }
  0xfb   :  { %628 = vmatprep.subr.bf16.mxu1 %v2844_v20  ;;  %v238_v20 = vrot.slane %v3646_v40, %v237_v16 }
  0xfe   :  { %629 = vmatpush1.bf16.msra.mxu1 %v2842_v21  ;;  %v242_v21 = vrot.slane %v3646_v40, %v241_v18  ;;  %v2959_v40 = vld [vmem:[#allocation8 + $0x8] sm:$0xff]  }
  0xff   :  { %630 = vmatprep.subr.bf16.mxu1 %v2847_v22  ;;  %v2950_v22 = vld [vmem:[#allocation7 + $0x1e0] ss:$8 sps:$4 sm:$0xff]  }
 0x102   :  { %631 = vmatpush1.bf16.msra.mxu1 %v2845_v23  ;;  %v2955_v23 = vld [vmem:[#allocation7 + $0x1f4] ss:$8 sps:$4 sm:$0xff]  }
 0x103   :  { %632 = vmatprep.subr.bf16.mxu1 %v2850_v24 }
 0x106   :  { %633 = vmatpush1.bf16.msra.mxu1 %v2848_v25 }
 0x107   :  { %634 = vmatprep.subr.bf16.mxu1 %v2853_v26 }
 0x10a   :  { %635 = vmatpush1.bf16.msra.mxu1 %v2851_v27 }
 0x10b   :  { %636 = vmatprep.subr.bf16.mxu1 %v2856_v28 }
 0x10e   :  { %637 = vmatpush1.bf16.msra.mxu1 %v2854_v29  ;;  %v2953_v29 = vld [vmem:[#allocation7 + $0x1f0] ss:$8 sps:$4 sm:$0xff]  }
 0x10f   :  { %638 = vmatprep.subr.bf16.mxu1 %v2859_v30 }
 0x112   :  { %639 = vmatpush1.bf16.msra.mxu1 %v2857_v31 }
 0x115   :  { %641 = vmatmul.mubr.bf16.vlgmr.msra.gmra.mrb[4].mxu1 %v3633_v48 }
 0x1a8   :  { %v601_v44 = vpop.f32.mrb[0].mxu1 }
 0x1a9   :  { %v602_v45 = vadd.f32 %v601_v44, %v230_v42  ;;  %v603_v46 = vpop.f32.mrb[1].mxu1  ;;  %v2960_v42 = vld [vmem:[#allocation8 + $0x50] sm:$0xff]   ;;  %v2962_v44 = vld [vmem:[#allocation8 + $0x58] sm:$0xff]  }
 0x1aa   :  { %v604_v47 = vadd.f32 %v603_v46, %v234_v43  ;;  %v605_v48 = vpop.f32.mrb[2].mxu1  ;;  %v2961_v43 = vld [vmem:[#allocation8 + $0x10] sm:$0xff]   ;;  %v2964_v46 = vld [vmem:[#allocation8 + $0x60] sm:$0xff]  }
 0x1ab   :  { %v649_v49 = vmax.f32 %v602_v45, 0.0  ;;  %v606_v50 = vpop.f32.mrb[3].mxu1  ;;  %v2963_v45 = vld [vmem:[#allocation8 + $0x18] sm:$0xff]   ;;  %v2966_v48 = vld [vmem:[#allocation8 + $0x68] sm:$0xff]  }
 0x1ac   :  { %v650_v51 = vmax.f32 %v604_v47, 0.0  ;;  %v2965_v47 = vld [vmem:[#allocation8 + $0x20] sm:$0xff]   ;;  %v2968_v50 = vld [vmem:[#allocation8 + $0x70] sm:$0xff]  }
 0x1ad   :  { %v653_v52 = vpack.c.bf16 %v649_v49, %v649_v49  ;;  %v2967_v49 = vld [vmem:[#allocation8 + $0x28] sm:$0xff]  }
 0x1ae   :  { %v654_v53 = vpack.c.bf16 %v650_v51, %v650_v51  ;;  %v2969_v51 = vld [vmem:[#allocation8 + $0x30] sm:$0xff]  }
 0x1b0   :  { %1085 = vmatprep.mubr.bf16.mxu0 %v654_v53  ;;  %v2971_v53 = vld [vmem:[#allocation8 + $0x38] sm:$0xff]  }
 0x1b1   :  { %1086 = vmatmul.mubr.bf16.vlgmr.msra.gmra.mrb[0].mxu0 %v653_v52  ;;  %v2970_v52 = vld [vmem:[#allocation8 + $0x78] sm:$0xff]  }
 0x1b2   :  { %1095 = vmatpush1.bf16.msra.mxu0 %v2908_v54  ;;  %v721_v54 = vld [vmem:[%s3728_s4] sm:$0x3]  ;;  %s3429_s4 = smov 96  }
 0x1b3   :  { %1096 = vmatprep.subr.bf16.mxu0 %v2913_v55  ;;  %v726_v55 = vrot.slane %v721_v54, %v3641_v39 }
 0x1b6   :  { %1097 = vmatpush1.bf16.msra.mxu0 %v2911_v56  ;;  %v730_v56 = vrot.slane %v721_v54, %v3649_v41  ;;  %v3019_v54 = vld [vmem:[#allocation13 + $0x1a4] ss:$16 sps:$4 sm:$0xff]  }
 0x1b7   :  { %1098 = vmatprep.subr.bf16.mxu0 %v2916_v57 }
 0x1ba   :  { %1099 = vmatpush1.bf16.msra.mxu0 %v2914_v58 }
 0x1bb   :  { %1100 = vmatprep.subr.bf16.mxu0 %v2919_v59 }
 0x1be   :  { %1101 = vmatpush1.bf16.msra.mxu0 %v2917_v60 }
 0x1bf   :  { %1102 = vmatprep.subr.bf16.mxu0 %v2922_v61 }
 0x1c2   :  { %1103 = vmatpush1.bf16.msra.mxu0 %v2920_v62 }
 0x1c3   :  { %1104 = vmatprep.subr.bf16.mxu0 %v2925_v63 }
 0x1c6   :  { %1105 = vmatpush1.bf16.msra.mxu0 %v2923_v0 }
 0x1c7   :  { %1106 = vmatprep.subr.bf16.mxu0 %v2928_v1 }
 0x1ca   :  { %1107 = vmatpush1.bf16.msra.mxu0 %v2926_v2 }
 0x1cb   :  { %1108 = vmatprep.subr.bf16.mxu0 %v2931_v3  ;;  %v2972_v3 = vld [vmem:[#allocation11] ss:$8 sps:$4 sm:$0xff]  }
 0x1ce   :  { %1109 = vmatpush1.bf16.msra.mxu0 %v2929_v4  ;;  %v2974_v4 = vld [vmem:[#allocation11 + $0x4] ss:$8 sps:$4 sm:$0xff]  }
 0x1cf   :  { %1110 = vmatprep.subr.bf16.mxu0 %v2934_v5  ;;  %1365 = vmatprep.subr.bf16.mxu1 %v2974_v4  ;;  %v3083_v4 = vld [vmem:[#allocation14 + $0x30] ss:$8 sps:$4 sm:$0xff]  }
 0x1d0   :  { %1366 = vmatpush1.bf16.msra.mxu1 %v2972_v3  ;;  %v3085_v3 = vld [vmem:[#allocation14 + $0x34] ss:$8 sps:$4 sm:$0xff]  }
 0x1d2   :  { %1111 = vmatpush1.bf16.msra.mxu0 %v2932_v6  ;;  %v2560_v6 = vld [vmem:[#allocation10] ss:$0 sm:$0xff] }
 0x1d3   :  { %1112 = vmatprep.subr.bf16.mxu0 %v2937_v7 }
 0x1d6   :  { %1113 = vmatpush1.bf16.msra.mxu0 %v2935_v8 }
 0x1d7   :  { %1114 = vmatprep.subr.bf16.mxu0 %v2940_v9 }
 0x1da   :  { %1115 = vmatpush1.bf16.msra.mxu0 %v2938_v10 }
 0x1db   :  { %1116 = vmatprep.subr.bf16.mxu0 %v2943_v11 }
 0x1de   :  { %1117 = vmatpush1.bf16.msra.mxu0 %v2941_v12 }
 0x1df   :  { %1118 = vmatprep.subr.bf16.mxu0 %v2946_v13 }
 0x1e2   :  { %1119 = vmatpush1.bf16.msra.mxu0 %v2944_v14  ;;  %v2977_v14 = vld [vmem:[#allocation11 + $0x14] ss:$8 sps:$4 sm:$0xff]  }
 0x1e3   :  { %1120 = vmatprep.subr.bf16.mxu0 %v2949_v15  ;;  %v2975_v15 = vld [vmem:[#allocation11 + $0x10] ss:$8 sps:$4 sm:$0xff]   ;;  %1367 = vmatprep.subr.bf16.mxu1 %v2977_v14  ;;  %v3098_v14 = vld [vmem:[#allocation14 + $0x80] ss:$8 sps:$4 sm:$0xff]  }
 0x1e4   :  { %1368 = vmatpush1.bf16.msra.mxu1 %v2975_v15  ;;  %v3103_v15 = vld [vmem:[#allocation14 + $0x94] ss:$8 sps:$4 sm:$0xff]  }
 0x1e6   :  { %1121 = vmatpush1.bf16.msra.mxu0 %v2947_v17  ;;  %v3428_v17 = vmov 0  }
 0x1e7   :  { %1122 = vmatprep.subr.bf16.mxu0 %v2952_v19  ;;  %1397 = vmatprep.mubr.bf16.mxu1 %v3428_v17  ;;  %v2980_v19 = vld [vmem:[#allocation13 + $0x4] ss:$16 sps:$4 sm:$0xff]   ;;  %v3101_v17 = vld [vmem:[#allocation14 + $0x90] ss:$8 sps:$4 sm:$0xff]  }
 0x1e8   :  { %v642_v24 = vpop.f32.mrb[4].mxu1  ;;  %1816 = vmatprep.subr.bf16.mxu1 %v2980_v19  ;;  %v3106_v19 = vld [vmem:[#allocation14 + $0xa4] ss:$8 sps:$4 sm:$0xff]  }
 0x1e9   :  { %v643_v25 = vadd.f32 %v642_v24, %v238_v20  ;;  %v644_v26 = vpop.f32.mrb[5].mxu1 }
 0x1ea   :  { %v645_v27 = vadd.f32 %v644_v26, %v242_v21  ;;  %v646_v28 = vpop.f32.mrb[6].mxu1  ;;  %1123 = vmatpush1.bf16.msra.mxu0 %v2950_v22  ;;  %v1317_v21 = vld [vmem:[%s3737_s13] sm:$0xff] }
 0x1eb   :  { %v651_v30 = vmax.f32 %v643_v25, 0.0  ;;  %v647_v31 = vpop.f32.mrb[7].mxu1  ;;  %1124 = vmatprep.subr.bf16.mxu0 %v2955_v23  ;;  %v2978_v25 = vld [vmem:[#allocation13] ss:$16 sps:$4 sm:$0xff]  }
 0x1ec   :  { %v652_v33 = vmax.f32 %v645_v27, 0.0  ;;  %v2983_v27 = vld [vmem:[#allocation13 + $0x24] ss:$16 sps:$4 sm:$0xff]   ;;  %v2981_v28 = vld [vmem:[#allocation13 + $0x20] ss:$16 sps:$4 sm:$0xff]  }
 0x1ed   :  { %v655_v36 = vpack.c.bf16 %v651_v30, %v651_v30  ;;  %v2984_v30 = vld [vmem:[#allocation13 + $0x40] ss:$16 sps:$4 sm:$0xff]   ;;  %v2989_v31 = vld [vmem:[#allocation13 + $0x64] ss:$16 sps:$4 sm:$0xff]  }
 0x1ee   :  { %v656_v34 = vpack.c.bf16 %v652_v33, %v652_v33  ;;  %1125 = vmatpush1.bf16.msra.mxu0 %v2953_v29  ;;  %v2986_v29 = vld [vmem:[#allocation13 + $0x44] ss:$16 sps:$4 sm:$0xff]  }
 0x1ef   :  { %2712 = vmatprep.subr.bf16.mxu0 %v2956_v32  ;;  %v2987_v32 = vld [vmem:[#allocation13 + $0x60] ss:$16 sps:$4 sm:$0xff]   ;;  %v2992_v33 = vld [vmem:[#allocation13 + $0x84] ss:$16 sps:$4 sm:$0xff]  }
 0x1f0   :  { %1126 = vmatprep.mubr.bf16.mxu0 %v656_v34  ;;  %v2990_v34 = vld [vmem:[#allocation13 + $0x80] ss:$16 sps:$4 sm:$0xff]  }
 0x1f1   :  { %1127 = vmatmul.mubr.bf16.vlgmr.msra.gmra.mrb[0].mxu0 %v655_v36  ;;  %v2993_v36 = vld [vmem:[#allocation13 + $0xa0] ss:$16 sps:$4 sm:$0xff]  }
 0x1f2   :  { %2713 = vmatpush3.bf16.msra.mxu0 %v2957_v35  ;;  %v2995_v35 = vld [vmem:[#allocation13 + $0xa4] ss:$16 sps:$4 sm:$0xff]  }
 0x1f3   :  { %2714 = vmatprep.subr.bf16.mxu0 %v2958_v37  ;;  %v2998_v37 = vld [vmem:[#allocation13 + $0xc4] ss:$16 sps:$4 sm:$0xff]  }
 0x1f6   :  { %2715 = vmatpush3.bf16.msra.mxu0 %v2959_v40  ;;  %v2996_v40 = vld [vmem:[#allocation13 + $0xc0] ss:$16 sps:$4 sm:$0xff]  }
 0x1f7   :  { %2716 = vmatprep.subr.bf16.mxu0 %v2960_v42  ;;  %v3001_v42 = vld [vmem:[#allocation13 + $0xe4] ss:$16 sps:$4 sm:$0xff]  }
 0x1fa   :  { %2717 = vmatpush3.bf16.msra.mxu0 %v2961_v43  ;;  %v2999_v43 = vld [vmem:[#allocation13 + $0xe0] ss:$16 sps:$4 sm:$0xff]  }
 0x1fb   :  { %2718 = vmatprep.subr.bf16.mxu0 %v2962_v44  ;;  %v3004_v44 = vld [vmem:[#allocation13 + $0x104] ss:$16 sps:$4 sm:$0xff]  }
 0x1fe   :  { %2719 = vmatpush3.bf16.msra.mxu0 %v2963_v45  ;;  %v3002_v45 = vld [vmem:[#allocation13 + $0x100] ss:$16 sps:$4 sm:$0xff]  }
 0x1ff   :  { %2720 = vmatprep.subr.bf16.mxu0 %v2964_v46  ;;  %v3007_v46 = vld [vmem:[#allocation13 + $0x124] ss:$16 sps:$4 sm:$0xff]  }
 0x202   :  { %2721 = vmatpush3.bf16.msra.mxu0 %v2965_v47  ;;  %v3005_v47 = vld [vmem:[#allocation13 + $0x120] ss:$16 sps:$4 sm:$0xff]  }
 0x203   :  { %2722 = vmatprep.subr.bf16.mxu0 %v2966_v48  ;;  %v3010_v48 = vld [vmem:[#allocation13 + $0x144] ss:$16 sps:$4 sm:$0xff]  }
 0x206   :  { %2723 = vmatpush3.bf16.msra.mxu0 %v2967_v49  ;;  %v3008_v49 = vld [vmem:[#allocation13 + $0x140] ss:$16 sps:$4 sm:$0xff]  }
 0x207   :  { %2724 = vmatprep.subr.bf16.mxu0 %v2968_v50  ;;  %v3013_v50 = vld [vmem:[#allocation13 + $0x164] ss:$16 sps:$4 sm:$0xff]  }
 0x20a   :  { %2725 = vmatpush3.bf16.msra.mxu0 %v2969_v51  ;;  %v3011_v51 = vld [vmem:[#allocation13 + $0x160] ss:$16 sps:$4 sm:$0xff]  }
 0x20b   :  { %2726 = vmatprep.subr.bf16.mxu0 %v2970_v52  ;;  %v3016_v52 = vld [vmem:[#allocation13 + $0x184] ss:$16 sps:$4 sm:$0xff]  }
 0x20e   :  { %2727 = vmatpush3.bf16.msra.mxu0 %v2971_v53  ;;  %v3014_v53 = vld [vmem:[#allocation13 + $0x180] ss:$16 sps:$4 sm:$0xff]  }
 0x2c4   :  { %v1128_v57 = vpop.f32.mrb[0].mxu0 }
 0x2c5   :  { %v2734_v58 = vadd.f32 %v1128_v57, %v726_v55  ;;  %v1130_v59 = vpop.f32.mrb[1].mxu0  ;;  %v3017_v55 = vld [vmem:[#allocation13 + $0x1a0] ss:$16 sps:$4 sm:$0xff]  }
 0x2c6   :  { %v2735_v60 = vadd.f32 %v1130_v59, %v730_v56  ;;  %v1132_v61 = vpop.f32.mrb[2].mxu0  ;;  %v3022_v56 = vld [vmem:[#allocation13 + $0x1c4] ss:$16 sps:$4 sm:$0xff]   ;;  %v3020_v57 = vld [vmem:[#allocation13 + $0x1c0] ss:$16 sps:$4 sm:$0xff]  }
 0x2c7   :  { %v1135_v62 = vmax.f32 %v2734_v58, 0.0  ;;  %v1133_v63 = vpop.f32.mrb[3].mxu0  ;;  %v3025_v58 = vld [vmem:[#allocation13 + $0x1e4] ss:$16 sps:$4 sm:$0xff]   ;;  %v3023_v59 = vld [vmem:[#allocation13 + $0x1e0] ss:$16 sps:$4 sm:$0xff]  }
 0x2c8   :  { %v1136_v0 = vmax.f32 %v2735_v60, 0.0  ;;  %v3028_v60 = vld [vmem:[#allocation13 + $0xc] ss:$16 sps:$4 sm:$0xff]   ;;  %v3074_v61 = vld [vmem:[#allocation14] ss:$8 sps:$4 sm:$0xff]  }
 0x2c9   :  { %v1137_v2 = vpack.c.bf16 %v1135_v62, %v1135_v62  ;;  %v3076_v62 = vld [vmem:[#allocation14 + $0x4] ss:$8 sps:$4 sm:$0xff]   ;;  %v3079_v63 = vld [vmem:[#allocation14 + $0x14] ss:$8 sps:$4 sm:$0xff]  }
 0x2ca   :  { %v1138_v1 = vpack.c.bf16 %v1136_v0, %v1136_v0  ;;  %2302 = vmatprep.subr.bf16.mxu0 %v3076_v62  ;;  %v3077_v0 = vld [vmem:[#allocation14 + $0x10] ss:$8 sps:$4 sm:$0xff]   ;;  %v3058_v62 = vld [vmem:[#allocation13 + $0x14c] ss:$16 sps:$4 sm:$0xff]  }
 0x2cc   :  { %1306 = vmatprep.mubr.bf16.mxu0 %v1138_v1  ;;  %v3082_v1 = vld [vmem:[#allocation14 + $0x24] ss:$8 sps:$4 sm:$0xff]  }
 0x2cd   :  { %1307 = vmatmul.mubr.bf16.vlgmr.msra.gmra.mrb[4].mxu0 %v1137_v2  ;;  %v3080_v2 = vld [vmem:[#allocation14 + $0x20] ss:$8 sps:$4 sm:$0xff]  }
 0x2ce   :  { %2303 = vmatpush1.bf16.msra.mxu0 %v3074_v61  ;;  %v3053_v61 = vld [vmem:[#allocation13 + $0x128] ss:$16 sps:$4 sm:$0xff]  }
 0x2cf   :  { %2304 = vmatprep.subr.bf16.mxu0 %v3079_v63  ;;  %v3056_v63 = vld [vmem:[#allocation13 + $0x148] ss:$16 sps:$4 sm:$0xff]  }
 0x2d2   :  { %2305 = vmatpush1.bf16.msra.mxu0 %v3077_v0  ;;  %v3061_v0 = vld [vmem:[#allocation13 + $0x16c] ss:$16 sps:$4 sm:$0xff]  }
 0x2d3   :  { %2306 = vmatprep.subr.bf16.mxu0 %v3082_v1  ;;  %v3059_v1 = vld [vmem:[#allocation13 + $0x168] ss:$16 sps:$4 sm:$0xff]  }
 0x2d6   :  { %2307 = vmatpush1.bf16.msra.mxu0 %v3080_v2  ;;  %v3064_v2 = vld [vmem:[#allocation13 + $0x18c] ss:$16 sps:$4 sm:$0xff]  }
 0x2d7   :  { %2308 = vmatprep.subr.bf16.mxu0 %v3085_v3  ;;  %v3062_v3 = vld [vmem:[#allocation13 + $0x188] ss:$16 sps:$4 sm:$0xff]  }
 0x2da   :  { %2309 = vmatpush1.bf16.msra.mxu0 %v3083_v4  ;;  %v3067_v4 = vld [vmem:[#allocation13 + $0x1ac] ss:$16 sps:$4 sm:$0xff]  }
 0x3a0   :  { %v2728_v5 = vpop.f32.mrb[4].mxu0 }
 0x3a1   :  { %v2729_v7 = vpop.f32.mrb[5].mxu0 }
 0x3a2   :  { %v2730_v8 = vadd.f32 %v2729_v7, %v2728_v5  ;;  %v2731_v9 = vpop.f32.mrb[6].mxu0  ;;  %v3088_v5 = vld [vmem:[#allocation14 + $0x44] ss:$8 sps:$4 sm:$0xff]   ;;  %v3091_v7 = vld [vmem:[#allocation14 + $0x54] ss:$8 sps:$4 sm:$0xff]  }
 0x3a3   :  { %v2732_v10 = vpop.f32.mrb[7].mxu0  ;;  %2310 = vmatprep.subr.bf16.mxu0 %v3088_v5  ;;  %v3094_v9 = vld [vmem:[#allocation14 + $0x64] ss:$8 sps:$4 sm:$0xff]   ;;  %v3065_v5 = vld [vmem:[#allocation13 + $0x1a8] ss:$16 sps:$4 sm:$0xff]  }
 0x3a4   :  { %v1309_v11 = vadd.f32 %v2730_v8, %v2560_v6  ;;  %v3086_v6 = vld [vmem:[#allocation14 + $0x40] ss:$8 sps:$4 sm:$0xff]   ;;  %v3089_v8 = vld [vmem:[#allocation14 + $0x50] ss:$8 sps:$4 sm:$0xff]  }
 0x3a5   :  { %2311 = vmatpush1.bf16.msra.mxu0 %v3086_v6  ;;  %v3092_v10 = vld [vmem:[#allocation14 + $0x60] ss:$8 sps:$4 sm:$0xff]   ;;  %v3070_v6 = vld [vmem:[#allocation13 + $0x1cc] ss:$16 sps:$4 sm:$0xff]  }
 0x3a6   :  { %v1314_v12 = vmul.f32 0.5, %v1309_v11  ;;  %2398 = vst [vmem:[#allocation17] sm:$0xff] %v1309_v11  ;;  %2312 = vmatprep.subr.bf16.mxu0 %v3091_v7  ;;  %v3068_v7 = vld [vmem:[#allocation13 + $0x1c8] ss:$16 sps:$4 sm:$0xff]  }
 0x3a8   :  { %v1315_v13 = vmul.f32 1.442695, %v1314_v12  ;;  %v3095_v12 = vld [vmem:[#allocation14 + $0x70] ss:$8 sps:$4 sm:$0xff]  }
 0x3a9   :  { %2313 = vmatpush1.bf16.msra.mxu0 %v3089_v8  ;;  %v3073_v8 = vld [vmem:[#allocation13 + $0x1ec] ss:$16 sps:$4 sm:$0xff]  }
 0x3aa   :  { %3170 = vpow2.f32 %v1315_v13  ;;  %2314 = vmatprep.subr.bf16.mxu0 %v3094_v9  ;;  %v3100_v13 = vld [vmem:[#allocation14 + $0x84] ss:$8 sps:$4 sm:$0xff]   ;;  %v3071_v9 = vld [vmem:[#allocation13 + $0x1e8] ss:$16 sps:$4 sm:$0xff]  }
 0x3ad   :  { %2315 = vmatpush1.bf16.msra.mxu0 %v3092_v10  ;;  %v3118_v10 = vld [vmem:[#allocation14 + $0xe4] ss:$8 sps:$4 sm:$0xff]  }
 0x3b4   :  { %v3171_v20 = vpop.eup %3170 }
 0x3b5   :  { %1319 = vrot.lane.b32.xlu0 %v3171_v20, %s3429_s4  ;;  %v3104_v20 = vld [vmem:[#allocation14 + $0xa0] ss:$8 sps:$4 sm:$0xff]  }
 0x427   :  { %v1320_v22 = vpop.permute.xlu0 %1319 }
 0x428   :  { %v1322_v23 = vmul.f32 %v1320_v22, %v1317_v21  ;;  %v3109_v21 = vld [vmem:[#allocation14 + $0xb4] ss:$8 sps:$4 sm:$0xff]   ;;  %v3107_v22 = vld [vmem:[#allocation14 + $0xb0] ss:$8 sps:$4 sm:$0xff]  }
 0x42a   :  { %v1323_v24 = vadd.f32 %v1322_v23, %v1309_v11  ;;  %v3097_v11 = vld [vmem:[#allocation14 + $0x74] ss:$8 sps:$4 sm:$0xff]   ;;  %v3112_v23 = vld [vmem:[#allocation14 + $0xc4] ss:$8 sps:$4 sm:$0xff]  }
 0x42b   :  { %2316 = vmatprep.subr.bf16.mxu0 %v3097_v11  ;;  %v3116_v11 = vld [vmem:[#allocation14 + $0xe0] ss:$8 sps:$4 sm:$0xff]  }
 0x42c   :  { %v1324_v26 = vpack.c.bf16 %v1323_v24, %v1323_v24  ;;  %2317 = vmatpush1.bf16.msra.mxu0 %v3095_v12  ;;  %v3110_v24 = vld [vmem:[#allocation14 + $0xc0] ss:$8 sps:$4 sm:$0xff]   ;;  %v3121_v12 = vld [vmem:[#allocation14 + $0xf4] ss:$8 sps:$4 sm:$0xff]  }
 0x42d   :  { %2318 = vmatprep.subr.bf16.mxu0 %v3100_v13  ;;  %v3119_v13 = vld [vmem:[#allocation14 + $0xf0] ss:$8 sps:$4 sm:$0xff]  }
 0x42e   :  { %2581 = vmatmul.mubr.msk.bf16.vlgmr.msra.gmra.mrb[8].mxu1 %vm1361_vm0, %v1324_v26  ;;  %v1329_v26 = vld [vmem:[%s3732_s8] sm:$0x3] }
 0x42f   :  { %1817 = vmatpush1.bf16.msra.mxu1 %v2978_v25  ;;  %v3115_v25 = vld [vmem:[#allocation14 + $0xd4] ss:$8 sps:$4 sm:$0xff]  }
 0x430   :  { %1818 = vmatprep.subr.bf16.mxu1 %v2983_v27  ;;  %2319 = vmatpush1.bf16.msra.mxu0 %v3098_v14  ;;  %v3113_v27 = vld [vmem:[#allocation14 + $0xd0] ss:$8 sps:$4 sm:$0xff]   ;;  %v3124_v14 = vld [vmem:[#allocation14 + $0x104] ss:$8 sps:$4 sm:$0xff]  }
 0x431   :  { %2320 = vmatprep.subr.bf16.mxu0 %v3103_v15  ;;  %v3683_v15 = vld [vmem:[%s3734_s10] sm:$0xf]  ;;  %s3430_s10 = smov [#allocation17]  }
 0x432   :  { %s2415_s5 = sshll.u32 %s3430_s10, 4  ;;  %s2416_s5 = int_to_ptr.vmem [resolvable:$true] %s2415_s5 }
 0x433   :  { %1819 = vmatpush1.bf16.msra.mxu1 %v2981_v28  ;;  %v1334_v28 = vrot.slane %v1329_v26, %v3641_v39  ;;  %s3356_s6 = scalar_lea.vmem %s2416_s5, 128  ;;  %p3361_p9 = scmp.lt.s32.totalorder %s2416_s5, %s2416_s5 }
 0x434   :  { %1820 = vmatprep.subr.bf16.mxu1 %v2986_v29  ;;  %2321 = vmatpush1.bf16.msra.mxu0 %v3101_v17  ;;  %v1338_v29 = vrot.slane %v1329_v26, %v3649_v41  ;;  %v1479_v17 = vrot.slane %v3683_v15, %v3641_v39  ;;  %p3357_p8 = scmp.ne.s32.totalorder %s2416_s5, %s3356_s6  ;;  %p3362_p10 = scmp.lt.s32.totalorder %s3356_s6, %s3356_s6 }
 0x435   :  { %2322 = vmatprep.subr.bf16.mxu0 %v3106_v19  ;;  %v1483_v19 = vrot.slane %v3683_v15, %v3649_v41 }
 0x436   :  { %p3363_p11 = por %p3362_p10, %p3361_p9 }
 0x437   :  { %1821 = vmatpush1.bf16.msra.mxu1 %v2984_v30 }
 0x438   :  { %1822 = vmatprep.subr.bf16.mxu1 %v2989_v31  ;;  %2323 = vmatpush1.bf16.msra.mxu0 %v3104_v20  ;;  %p3364_p12 = pnand %p3363_p11, %p3357_p8 }
 0x439   :  { %2324 = vmatprep.subr.bf16.mxu0 %v3109_v21 }
 0x43b   :  { %1823 = vmatpush1.bf16.msra.mxu1 %v2987_v32 }
 0x43c   :  { %1824 = vmatprep.subr.bf16.mxu1 %v2992_v33  ;;  %2325 = vmatpush1.bf16.msra.mxu0 %v3107_v22 }
 0x43d   :  { %2326 = vmatprep.subr.bf16.mxu0 %v3112_v23 }
 0x43f   :  { %1825 = vmatpush1.bf16.msra.mxu1 %v2990_v34 }
 0x440   :  { %1826 = vmatprep.subr.bf16.mxu1 %v2995_v35  ;;  %2327 = vmatpush1.bf16.msra.mxu0 %v3110_v24 }
 0x441   :  { %2328 = vmatprep.subr.bf16.mxu0 %v3115_v25 }
 0x443   :  { %1827 = vmatpush1.bf16.msra.mxu1 %v2993_v36 }
 0x444   :  { %1828 = vmatprep.subr.bf16.mxu1 %v2998_v37  ;;  %2329 = vmatpush1.bf16.msra.mxu0 %v3113_v27 }
 0x445   :  { %2330 = vmatprep.subr.bf16.mxu0 %v3118_v10 }
 0x447   :  { %1829 = vmatpush1.bf16.msra.mxu1 %v2996_v40 }
 0x448   :  { %1830 = vmatprep.subr.bf16.mxu1 %v3001_v42  ;;  %v3026_v42 = vld [vmem:[#allocation13 + $0x8] ss:$16 sps:$4 sm:$0xff]   ;;  %2331 = vmatpush1.bf16.msra.mxu0 %v3116_v11 }
 0x449   :  { %2332 = vmatprep.subr.bf16.mxu0 %v3121_v12 }
 0x44b   :  { %1831 = vmatpush1.bf16.msra.mxu1 %v2999_v43 }
 0x44c   :  { %1832 = vmatprep.subr.bf16.mxu1 %v3004_v44  ;;  %v3031_v44 = vld [vmem:[#allocation13 + $0x2c] ss:$16 sps:$4 sm:$0xff]   ;;  %2333 = vmatpush1.bf16.msra.mxu0 %v3119_v13 }
 0x44d   :  { %2343 = vmatprep.subr.bf16.mxu0 %v3124_v14 }
 0x44f   :  { %1833 = vmatpush1.bf16.msra.mxu1 %v3002_v45  ;;  %v3029_v45 = vld [vmem:[#allocation13 + $0x28] ss:$16 sps:$4 sm:$0xff]  }
 0x450   :  { %1834 = vmatprep.subr.bf16.mxu1 %v3007_v46  ;;  %v3034_v46 = vld [vmem:[#allocation13 + $0x4c] ss:$16 sps:$4 sm:$0xff]  }
 0x453   :  { %1835 = vmatpush1.bf16.msra.mxu1 %v3005_v47  ;;  %v3032_v47 = vld [vmem:[#allocation13 + $0x48] ss:$16 sps:$4 sm:$0xff]  }
 0x454   :  { %1836 = vmatprep.subr.bf16.mxu1 %v3010_v48  ;;  %v3037_v48 = vld [vmem:[#allocation13 + $0x6c] ss:$16 sps:$4 sm:$0xff]  }
 0x457   :  { %1837 = vmatpush1.bf16.msra.mxu1 %v3008_v49  ;;  %v3035_v49 = vld [vmem:[#allocation13 + $0x68] ss:$16 sps:$4 sm:$0xff]  }
 0x458   :  { %1838 = vmatprep.subr.bf16.mxu1 %v3013_v50  ;;  %v3040_v50 = vld [vmem:[#allocation13 + $0x8c] ss:$16 sps:$4 sm:$0xff]  }
 0x45b   :  { %1839 = vmatpush1.bf16.msra.mxu1 %v3011_v51  ;;  %v3038_v51 = vld [vmem:[#allocation13 + $0x88] ss:$16 sps:$4 sm:$0xff]  }
 0x45c   :  { %1840 = vmatprep.subr.bf16.mxu1 %v3016_v52  ;;  %v3043_v52 = vld [vmem:[#allocation13 + $0xac] ss:$16 sps:$4 sm:$0xff]  }
 0x45f   :  { %1841 = vmatpush1.bf16.msra.mxu1 %v3014_v53  ;;  %v3041_v53 = vld [vmem:[#allocation13 + $0xa8] ss:$16 sps:$4 sm:$0xff]  }
 0x460   :  { %1842 = vmatprep.subr.bf16.mxu1 %v3019_v54  ;;  %v3046_v54 = vld [vmem:[#allocation13 + $0xcc] ss:$16 sps:$4 sm:$0xff]  }
 0x463   :  { %1843 = vmatpush1.bf16.msra.mxu1 %v3017_v55  ;;  %v3044_v55 = vld [vmem:[#allocation13 + $0xc8] ss:$16 sps:$4 sm:$0xff]  }
 0x464   :  { %1844 = vmatprep.subr.bf16.mxu1 %v3022_v56  ;;  %v3049_v56 = vld [vmem:[#allocation13 + $0xec] ss:$16 sps:$4 sm:$0xff]  }
 0x467   :  { %1845 = vmatpush1.bf16.msra.mxu1 %v3020_v57  ;;  %v3047_v57 = vld [vmem:[#allocation13 + $0xe8] ss:$16 sps:$4 sm:$0xff]  }
 0x468   :  { %1846 = vmatprep.subr.bf16.mxu1 %v3025_v58  ;;  %v3052_v58 = vld [vmem:[#allocation13 + $0x10c] ss:$16 sps:$4 sm:$0xff]  }
 0x46b   :  { %1847 = vmatpush1.bf16.msra.mxu1 %v3023_v59  ;;  %v3050_v59 = vld [vmem:[#allocation13 + $0x108] ss:$16 sps:$4 sm:$0xff]  }
 0x46c   :  { %1857 = vmatprep.subr.bf16.mxu1 %v3028_v60  ;;  %v3055_v60 = vld [vmem:[#allocation13 + $0x12c] ss:$16 sps:$4 sm:$0xff]  }
 0x501   :  { %v1399_v30 = vpop.f32.mrb[8].mxu1 }
 0x502   :  { %v1400_v31 = vadd.f32 %v1399_v30, %v1334_v28  ;;  %v1401_v32 = vpop.f32.mrb[9].mxu1 }
 0x503   :  { %v1402_v33 = vadd.f32 %v1401_v32, %v1338_v29  ;;  %v1403_v34 = vpop.f32.mrb[10].mxu1  ;;  %v3122_v29 = vld [vmem:[#allocation14 + $0x100] ss:$8 sps:$4 sm:$0xff]   ;;  %v3125_v32 = vld [vmem:[#allocation14 + $0x110] ss:$8 sps:$4 sm:$0xff]  }
 0x504   :  { %v1406_v35 = vmax.f32 %v1400_v31, 0.0  ;;  %v1404_v36 = vpop.f32.mrb[11].mxu1  ;;  %v3127_v31 = vld [vmem:[#allocation14 + $0x114] ss:$8 sps:$4 sm:$0xff]   ;;  %v3128_v34 = vld [vmem:[#allocation14 + $0x120] ss:$8 sps:$4 sm:$0xff]  }
 0x505   :  { %v1407_v37 = vmax.f32 %v1402_v33, 0.0  ;;  %v3130_v33 = vld [vmem:[#allocation14 + $0x124] ss:$8 sps:$4 sm:$0xff]   ;;  %v3131_v36 = vld [vmem:[#allocation14 + $0x130] ss:$8 sps:$4 sm:$0xff]  }
 0x506   :  { %v3676_v43 = vpack.c.bf16 %v1406_v35, %v1406_v35  ;;  %v3133_v35 = vld [vmem:[#allocation14 + $0x134] ss:$8 sps:$4 sm:$0xff]  }
 0x507   :  { %v1409_v40 = vpack.c.bf16 %v1407_v37, %v1407_v37  ;;  %v3136_v37 = vld [vmem:[#allocation14 + $0x144] ss:$8 sps:$4 sm:$0xff]  }
 0x509   :  { %1848 = vmatprep.mubr.bf16.mxu1 %v1409_v40 }
 0x50a   :  { %1849 = vmatmul.mubr.bf16.vlgmr.msra.gmra.mrb[12].mxu1 %v3676_v43 }
 0x50b   :  { %1858 = vmatpush1.bf16.msra.mxu1 %v3026_v42  ;;  %1889 = vmatprep.mubr.bf16.mxu1 %v1409_v40  ;;  %v3134_v40 = vld [vmem:[#allocation14 + $0x140] ss:$8 sps:$4 sm:$0xff]   ;;  %v3139_v42 = vld [vmem:[#allocation14 + $0x154] ss:$8 sps:$4 sm:$0xff]  }
 0x50c   :  { %1859 = vmatprep.subr.bf16.mxu1 %v3031_v44  ;;  %v3142_v44 = vld [vmem:[#allocation14 + $0x164] ss:$8 sps:$4 sm:$0xff]  }
 0x50f   :  { %1860 = vmatpush1.bf16.msra.mxu1 %v3029_v45  ;;  %v3140_v45 = vld [vmem:[#allocation14 + $0x160] ss:$8 sps:$4 sm:$0xff]  }
 0x510   :  { %1861 = vmatprep.subr.bf16.mxu1 %v3034_v46  ;;  %v3145_v46 = vld [vmem:[#allocation14 + $0x174] ss:$8 sps:$4 sm:$0xff]  }
 0x513   :  { %1862 = vmatpush1.bf16.msra.mxu1 %v3032_v47  ;;  %v3143_v47 = vld [vmem:[#allocation14 + $0x170] ss:$8 sps:$4 sm:$0xff]  }
 0x514   :  { %1863 = vmatprep.subr.bf16.mxu1 %v3037_v48  ;;  %v3148_v48 = vld [vmem:[#allocation14 + $0x184] ss:$8 sps:$4 sm:$0xff]  }
 0x517   :  { %1864 = vmatpush1.bf16.msra.mxu1 %v3035_v49  ;;  %v3146_v49 = vld [vmem:[#allocation14 + $0x180] ss:$8 sps:$4 sm:$0xff]  }
 0x518   :  { %1865 = vmatprep.subr.bf16.mxu1 %v3040_v50  ;;  %v3151_v50 = vld [vmem:[#allocation14 + $0x194] ss:$8 sps:$4 sm:$0xff]  }
 0x51b   :  { %1866 = vmatpush1.bf16.msra.mxu1 %v3038_v51  ;;  %v3149_v51 = vld [vmem:[#allocation14 + $0x190] ss:$8 sps:$4 sm:$0xff]  }
 0x51c   :  { %1867 = vmatprep.subr.bf16.mxu1 %v3043_v52  ;;  %v3154_v52 = vld [vmem:[#allocation14 + $0x1a4] ss:$8 sps:$4 sm:$0xff]  }
 0x51f   :  { %1868 = vmatpush1.bf16.msra.mxu1 %v3041_v53  ;;  %v3152_v53 = vld [vmem:[#allocation14 + $0x1a0] ss:$8 sps:$4 sm:$0xff]  }
 0x520   :  { %1869 = vmatprep.subr.bf16.mxu1 %v3046_v54  ;;  %v3157_v54 = vld [vmem:[#allocation14 + $0x1b4] ss:$8 sps:$4 sm:$0xff]  }
 0x523   :  { %1870 = vmatpush1.bf16.msra.mxu1 %v3044_v55  ;;  %v3155_v55 = vld [vmem:[#allocation14 + $0x1b0] ss:$8 sps:$4 sm:$0xff]  }
 0x524   :  { %1871 = vmatprep.subr.bf16.mxu1 %v3049_v56  ;;  %v3160_v56 = vld [vmem:[#allocation14 + $0x1c4] ss:$8 sps:$4 sm:$0xff]  }
 0x527   :  { %1872 = vmatpush1.bf16.msra.mxu1 %v3047_v57  ;;  %v3158_v57 = vld [vmem:[#allocation14 + $0x1c0] ss:$8 sps:$4 sm:$0xff]  }
 0x528   :  { %1873 = vmatprep.subr.bf16.mxu1 %v3052_v58  ;;  %v3163_v58 = vld [vmem:[#allocation14 + $0x1d4] ss:$8 sps:$4 sm:$0xff]  }
 0x52b   :  { %1874 = vmatpush1.bf16.msra.mxu1 %v3050_v59  ;;  %v3161_v59 = vld [vmem:[#allocation14 + $0x1d0] ss:$8 sps:$4 sm:$0xff]  }
 0x52c   :  { %1875 = vmatprep.subr.bf16.mxu1 %v3055_v60  ;;  %v3166_v60 = vld [vmem:[#allocation14 + $0x1e4] ss:$8 sps:$4 sm:$0xff]  }
 0x52f   :  { %1876 = vmatpush1.bf16.msra.mxu1 %v3053_v61  ;;  %v1487_v61 = vrot.slane %v3683_v15, %v237_v16 }
 0x530   :  { %1877 = vmatprep.subr.bf16.mxu1 %v3058_v62  ;;  %v1491_v62 = vrot.slane %v3683_v15, %v241_v18 }
 0x533   :  { %1878 = vmatpush1.bf16.msra.mxu1 %v3056_v63  ;;  %v3164_v63 = vld [vmem:[#allocation14 + $0x1e0] ss:$8 sps:$4 sm:$0xff]  }
 0x534   :  { %1879 = vmatprep.subr.bf16.mxu1 %v3061_v0  ;;  %v3169_v0 = vld [vmem:[#allocation14 + $0x1f4] ss:$8 sps:$4 sm:$0xff]  }
 0x537   :  { %1880 = vmatpush1.bf16.msra.mxu1 %v3059_v1 }
 0x538   :  { %1881 = vmatprep.subr.bf16.mxu1 %v3064_v2 }
 0x53b   :  { %1882 = vmatpush1.bf16.msra.mxu1 %v3062_v3 }
 0x53c   :  { %1883 = vmatprep.subr.bf16.mxu1 %v3067_v4 }
 0x53f   :  { %1884 = vmatpush1.bf16.msra.mxu1 %v3065_v5 }
 0x540   :  { %1885 = vmatprep.subr.bf16.mxu1 %v3070_v6  ;;  %v3167_v6 = vld [vmem:[#allocation14 + $0x1f0] ss:$8 sps:$4 sm:$0xff]  }
 0x543   :  { %1886 = vmatpush1.bf16.msra.mxu1 %v3068_v7 }
 0x544   :  { %1887 = vmatprep.subr.bf16.mxu1 %v3073_v8 }
 0x547   :  { %1888 = vmatpush1.bf16.msra.mxu1 %v3071_v9 }
 0x54a   :  { %1890 = vmatmul.mubr.bf16.vlgmr.msra.gmra.mrb[16].mxu1 %v3676_v43  ;;  %v3137_v43 = vld [vmem:[#allocation14 + $0x150] ss:$8 sps:$4 sm:$0xff]  }
 0x5dd   :  { %v1850_v20 = vpop.f32.mrb[12].mxu1 }
 0x5de   :  { %v1851_v21 = vadd.f32 %v1850_v20, %v1479_v17  ;;  %v1852_v22 = vpop.f32.mrb[13].mxu1 }
 0x5df   :  { %v1853_v23 = vadd.f32 %v1852_v22, %v1483_v19  ;;  %v1854_v24 = vpop.f32.mrb[14].mxu1 }
 0x5e0   :  { %v1898_v25 = vmax.f32 %v1851_v21, 0.0  ;;  %v1855_v26 = vpop.f32.mrb[15].mxu1 }
 0x5e1   :  { %v1899_v27 = vmax.f32 %v1853_v23, 0.0 }
 0x5e2   :  { %v1902_v30 = vpack.c.bf16 %v1898_v25, %v1898_v25 }
 0x5e3   :  { %v1903_v28 = vpack.c.bf16 %v1899_v27, %v1899_v27 }
 0x5e5   :  { %2334 = vmatprep.mubr.bf16.mxu0 %v1903_v28 }
 0x5e6   :  { %2335 = vmatmul.mubr.bf16.vlgmr.msra.gmra.mrb[8].mxu0 %v1902_v30 }
 0x5e7   :  { %2344 = vmatpush1.bf16.msra.mxu0 %v3122_v29 }
 0x5e8   :  { %2345 = vmatprep.subr.bf16.mxu0 %v3127_v31 }
 0x5eb   :  { %2346 = vmatpush1.bf16.msra.mxu0 %v3125_v32 }
 0x5ec   :  { %2347 = vmatprep.subr.bf16.mxu0 %v3130_v33 }
 0x5ef   :  { %2348 = vmatpush1.bf16.msra.mxu0 %v3128_v34 }
 0x5f0   :  { %2349 = vmatprep.subr.bf16.mxu0 %v3133_v35 }
 0x5f3   :  { %2350 = vmatpush1.bf16.msra.mxu0 %v3131_v36 }
 0x5f4   :  { %2351 = vmatprep.subr.bf16.mxu0 %v3136_v37 }
 0x5f7   :  { %2352 = vmatpush1.bf16.msra.mxu0 %v3134_v40 }
 0x5f8   :  { %2353 = vmatprep.subr.bf16.mxu0 %v3139_v42 }
 0x5fb   :  { %2354 = vmatpush1.bf16.msra.mxu0 %v3137_v43 }
 0x5fc   :  { %2355 = vmatprep.subr.bf16.mxu0 %v3142_v44 }
 0x5ff   :  { %2356 = vmatpush1.bf16.msra.mxu0 %v3140_v45 }
 0x600   :  { %2357 = vmatprep.subr.bf16.mxu0 %v3145_v46 }
 0x603   :  { %2358 = vmatpush1.bf16.msra.mxu0 %v3143_v47 }
 0x604   :  { %2359 = vmatprep.subr.bf16.mxu0 %v3148_v48 }
 0x607   :  { %2360 = vmatpush1.bf16.msra.mxu0 %v3146_v49 }
 0x608   :  { %2361 = vmatprep.subr.bf16.mxu0 %v3151_v50 }
 0x60b   :  { %2362 = vmatpush1.bf16.msra.mxu0 %v3149_v51 }
 0x60c   :  { %2363 = vmatprep.subr.bf16.mxu0 %v3154_v52 }
 0x60f   :  { %2364 = vmatpush1.bf16.msra.mxu0 %v3152_v53 }
 0x610   :  { %2365 = vmatprep.subr.bf16.mxu0 %v3157_v54 }
 0x613   :  { %2366 = vmatpush1.bf16.msra.mxu0 %v3155_v55 }
 0x614   :  { %2367 = vmatprep.subr.bf16.mxu0 %v3160_v56 }
 0x617   :  { %2368 = vmatpush1.bf16.msra.mxu0 %v3158_v57 }
 0x618   :  { %2369 = vmatprep.subr.bf16.mxu0 %v3163_v58 }
 0x61b   :  { %2370 = vmatpush1.bf16.msra.mxu0 %v3161_v59 }
 0x61c   :  { %2371 = vmatprep.subr.bf16.mxu0 %v3166_v60 }
 0x61d   :  { %v1891_v1 = vpop.f32.mrb[16].mxu1 }
 0x61e   :  { %v1892_v2 = vadd.f32 %v1891_v1, %v1487_v61  ;;  %v1893_v3 = vpop.f32.mrb[17].mxu1 }
 0x61f   :  { %v1894_v4 = vadd.f32 %v1893_v3, %v1491_v62  ;;  %v1895_v5 = vpop.f32.mrb[18].mxu1  ;;  %2372 = vmatpush1.bf16.msra.mxu0 %v3164_v63 }
 0x620   :  { %v1900_v7 = vmax.f32 %v1892_v2, 0.0  ;;  %v1896_v8 = vpop.f32.mrb[19].mxu1  ;;  %2373 = vmatprep.subr.bf16.mxu0 %v3169_v0 }
 0x621   :  { %v1901_v9 = vmax.f32 %v1894_v4, 0.0 }
 0x622   :  { %v1904_v10 = vpack.c.bf16 %v1900_v7, %v1900_v7 }
 0x623   :  { %v1905_v16 = vpack.c.bf16 %v1901_v9, %v1901_v9  ;;  %2374 = vmatpush1.bf16.msra.mxu0 %v3167_v6 }
 0x625   :  { %2375 = vmatprep.mubr.bf16.mxu0 %v1905_v16 }
 0x626   :  { %2376 = vmatmul.mubr.bf16.vlgmr.msra.gmra.mrb[8].mxu0 %v1904_v10 }
 0x627   :  { %3367 = shalt.err (!%p3364_p12)
}
 0x628   :  { %s3368_s28 = scalar_lea.hbm %s3739_s15, 128 }
 0x629   :  { %p3369_p13 = scmp.ne.s32.totalorder %s3739_s15, %s3368_s28  ;;  %p3372_p0 = scmp.lt.u32.totalorder %s3368_s28, %s3739_s15 }
 0x62b   :  { %p3374_p1 = pnand %p3372_p0, %p3369_p13 }
 0x62d   :  { %3377 = shalt.err (!%p3374_p1)
}
 0x62e   :  { %2418 = dma.vmem_to_hbm [thread:$0]  %s2416_s5, 128, %s3739_s15, [#allocation18]   ;;  %v1970_v38 = vld [vmem:[%s3736_s12] sm:$0x3] }
 0x62f   :  { %v1975_v18 = vrot.slane %v1970_v38, %v3641_v39  ;;  %v1979_v11 = vrot.slane %v1970_v38, %v3649_v41  ;;  %s3431_s12 = smov [#allocation16]  }
 0x630   :  { %s2405_s15 = sshll.u32 %s3431_s12, 4  ;;  %s2406_s15 = int_to_ptr.vmem [resolvable:$true] %s2405_s15 }
 0x631   :  { %s3378_s25 = scalar_lea.vmem %s2406_s15, 256  ;;  %p3383_p3 = scmp.lt.s32.totalorder %s2406_s15, %s2406_s15 }
 0x632   :  { %p3379_p2 = scmp.ne.s32.totalorder %s2406_s15, %s3378_s25  ;;  %p3384_p4 = scmp.lt.s32.totalorder %s3378_s25, %s3378_s25 }
 0x634   :  { %p3385_p5 = por %p3384_p4, %p3383_p3 }
 0x636   :  { %p3386_p6 = pnand %p3385_p5, %p3379_p2 }
 0x6f9   :  { %v2377_v12 = vpop.f32.mrb[8].mxu0 }
 0x6fa   :  { %v2736_v13 = vadd.f32 %v2377_v12, %v1975_v18  ;;  %v2379_v14 = vpop.f32.mrb[9].mxu0 }
 0x6fb   :  { %v2737_v15 = vadd.f32 %v2379_v14, %v1979_v11  ;;  %v2381_v17 = vpop.f32.mrb[10].mxu0 }
 0x6fc   :  { %v2710_v19 = vmul.f32 -1.442695, %v2736_v13  ;;  %v2382_v20 = vpop.f32.mrb[11].mxu0 }
 0x6fd   :  { %v2711_v21 = vmul.f32 -1.442695, %v2737_v15 }
 0x6fe   :  { %3172 = vpow2.f32 %v2710_v19 }
 0x6ff   :  { %3174 = vpow2.f32 %v2711_v21 }
 0x708   :  { %v3173_v22 = vpop.eup %3172 }
 0x709   :  { %v3175_v23 = vpop.eup %3174  ;;  %v2390_v24 = vadd.f32 1.0, %v3173_v22 }
 0x70a   :  { %v2391_v25 = vadd.f32 1.0, %v3175_v23 }
 0x70b   :  { %3176 = vrcp.f32 %v2390_v24 }
 0x70c   :  { %3178 = vrcp.f32 %v2391_v25 }
 0x715   :  { %v3177_v39 = vpop.eup %3176 }
 0x716   :  { %v3179_v41 = vpop.eup %3178  ;;  %2396 = vst [vmem:[#allocation16] sm:$0xff] %v3177_v39 }
 0x717   :  { %2397 = vst [vmem:[#allocation16 + $0x8] sm:$0xff] %v3179_v41 }
 0x718   :  { %3389 = shalt.err (!%p3386_p6)
}
 0x719   :  { %s3390_s11 = scalar_lea.hbm %s3738_s14, 256 }
 0x71a   :  { %p3391_p7 = scmp.ne.s32.totalorder %s3738_s14, %s3390_s11  ;;  %p3394_p8 = scmp.lt.u32.totalorder %s3390_s11, %s3738_s14 }
 0x71c   :  { %p3396_p9 = pnand %p3394_p8, %p3391_p7 }
 0x71e   :  { %3399 = shalt.err (!%p3396_p9)
}
 0x71f   :  { %2408 = dma.vmem_to_hbm [thread:$0]  %s2406_s15, 256, %s3738_s14, [#allocation4]  }
 0x720   :  { %3410 = dma.done.wait [#allocation4], 256  }
 0x721   :  { %3411 = vsyncadd [#allocation4], 4294967040 }
 0x722   :  { %3412 = dma.done.wait [#allocation18], 128  }
 0x723   :  { %3413 = vsyncadd [#allocation18], 4294967168 }
 0x724   :  { %2425 = vsyncpa [#allocation3], 1 }
 0x725   :  { %2426 = vsyncpa [#allocation6], 1 }
 0x726   :  { %2427 = vsyncpa [#allocation9], 1 }
 0x727   :  { %2428 = vsyncpa [#allocation12], 1 }
 0x728   :  { %2429 = vsyncpa [#allocation15], 1 }
 0x729   :  { %2430 = vsyncpa [#allocation4], 1 }
 0x72a   :  { %2431 = vsyncpa [#allocation18], 1 }

</bundles_post_ra>
